<compile_context>
chip_gen: v7x
topology: tpu7x:2x2x1
jax: 0.10.0
libtpu: 0.0.40
codegen_flags: <defaults>
</compile_context>

<pallas_src>
import numpy as np
import jax
import jax.numpy as jnp
from jax.experimental import pallas as pl
from jax.experimental.pallas import tpu as pltpu

BN_EPS = 1e-5
LANE = 128
# bf16 matmul inputs are recommended on v6e/v7x (MXU-native, halves VMEM/HBM
# bytes).  Default f32 keeps exact numerical parity with the torch module.
# BatchNorm / head accumulation is f32 regardless (v5e has no bf16 VPU/EUP).
MATMUL_DTYPE = jnp.float32


def conv2d_size_out(size, kernel_size=3, stride=2):
    return (size - (kernel_size - 1) - 1) // stride + 1


def _round_up_lanes(n):
    return ((n + LANE - 1) // LANE) * LANE


def _vmem_spec():
    return pl.BlockSpec(memory_space=pltpu.MemorySpace.VMEM)


# ----------------------------- Pallas kernel ------------------------------- #

def _bn_relu(y, gamma, beta, n_rows):
    """Training-mode BatchNorm2d (biased batch variance over rows) + ReLU.

    One-pass sum / sum-of-squares statistics, fused per-channel scale/shift.
    Zero-padded channels (gamma == 0, y == 0) stay exactly 0.
    """
    inv_m = 1.0 / n_rows
    s = jnp.sum(y, axis=0, keepdims=True)
    ss = jnp.sum(y * y, axis=0, keepdims=True)
    mean = s * inv_m
    var = jnp.maximum(ss * inv_m - mean * mean, 0.0)
    scale = gamma * jax.lax.rsqrt(var + BN_EPS)
    shift = beta - mean * scale
    return jnp.maximum(y * scale + shift, 0.0)


def fused_forward_kernel(p1_ref, w1_ref, g1_ref, bt1_ref,
                         selA_ref, w2_ref, g2_ref, bt2_ref,
                         selB_ref, wh_ref, bh_ref, o_ref):
    n_taps = selA_ref.shape[0]      # 3*3 kernel taps of conv2
    n_spatial = selB_ref.shape[0]   # OH2*OW2 spatial positions for the head
    m1 = p1_ref.shape[0]            # N*OH1*OW1
    m2 = selA_ref.shape[1]          # N*OH2*OW2
    c = w1_ref.shape[1]             # channels, padded to 128 lanes

    # ---- layer 1: conv1 as one patch-matmul on the MXU + BN + ReLU -------
    # Conv bias intentionally omitted: it is cancelled by the BN mean.
    y1 = jnp.dot(p1_ref[...], w1_ref[...], preferred_element_type=jnp.float32)
    y1 = _bn_relu(y1, g1_ref[...], bt1_ref[...], m1)

    # ---- layer 2: stride-2 3x3 conv, im2col done entirely in VMEM --------
    # Each tap (kh, kw): a constant 0/1 row-selection matmul gathers the
    # strided spatial window of y1 (this IS the layer-2 im2col), then the
    # tap's [C, C] weight block is applied; accumulate in f32.  y1 never
    # leaves VMEM.
    y1c = y1.astype(w2_ref.dtype)
    y2 = jnp.zeros((m2, c), jnp.float32)
    for k in range(n_taps):
        g = jnp.dot(selA_ref[k], y1c, preferred_element_type=jnp.float32)
        y2 = y2 + jnp.dot(g.astype(w2_ref.dtype), w2_ref[k],
                          preferred_element_type=jnp.float32)
    y2 = _bn_relu(y2, g2_ref[...], bt2_ref[...], m2)

    # ---- head: Linear over torch's NCHW flatten --------------------------
    # The flatten permutation is folded into wh (one [C, A] block per spatial
    # position), so no transpose/reshape is needed; a constant 0/1 matmul
    # gathers each spatial position's batch rows.
    y2c = y2.astype(wh_ref.dtype)
    acc = jnp.zeros(o_ref.shape, jnp.float32)
    for s in range(n_spatial):
        rows = jnp.dot(selB_ref[s], y2c, preferred_element_type=jnp.float32)
        acc = acc + jnp.dot(rows.astype(wh_ref.dtype), wh_ref[s],
                            preferred_element_type=jnp.float32)
    o_ref[...] = acc + bh_ref[...]


# ------------------------------ host-side glue ------------------------------ #

def extract_patches(x_nhwc, k=3, s=2):
    """im2col for a stride-s, kxk, 'valid' conv.  Returns [N*OH*OW, k*k*C]."""
    N, H, W, C = x_nhwc.shape
    OH = conv2d_size_out(H, k, s)
    OW = conv2d_size_out(W, k, s)
    cols = []
    for kh in range(k):
        for kw in range(k):
            cols.append(x_nhwc[:, kh:kh + s * OH:s, kw:kw + s * OW:s, :])
    p = jnp.stack(cols, axis=3)                 # [N, OH, OW, k*k, C]
    return p.reshape(N * OH * OW, k * k * C), (N, OH, OW, C)


def prepare_kernel_operands(params, batch_n, h, w):
    """One-time preprocessing per (params, batch, resolution).

    Folds the NCHW-flatten permutation into the head weight, splits conv2 /
    head weights into per-tap blocks, zero-pads channel & action lanes to 128,
    and builds the constant 0/1 gather matrices that implement the layer-2
    im2col and the head's per-spatial row gather inside the kernel.
    Under jit all of this folds into constants.
    """
    mid_n = params["w1"].shape[-1]
    action_n = params["wh"].shape[-1]
    oh1, ow1 = conv2d_size_out(h), conv2d_size_out(w)
    oh2, ow2 = conv2d_size_out(oh1), conv2d_size_out(ow1)
    s_out = oh2 * ow2
    m1 = batch_n * oh1 * ow1
    m2 = batch_n * s_out
    c_pad = _round_up_lanes(mid_n)
    a_pad = _round_up_lanes(action_n)
    f32 = jnp.float32

    # conv1 weight [kh, kw, cin, cout] -> [K1, C_PAD] (zero-padded lanes).
    w1 = params["w1"]
    k1 = w1.shape[0] * w1.shape[1] * w1.shape[2]
    w1_pad = jnp.zeros((k1, c_pad), f32).at[:, :mid_n].set(w1.reshape(k1, mid_n))

    # conv2 weight split into its 3x3 taps: [9, C_PAD, C_PAD].
    w2 = params["w2"]
    n_taps = w2.shape[0] * w2.shape[1]
    w2_taps = jnp.zeros((n_taps, c_pad, c_pad), f32)
    w2_taps = w2_taps.at[:, :mid_n, :mid_n].set(w2.reshape(n_taps, mid_n, mid_n))

    # head weight: torch flatten index f = c*S + s  ->  per-spatial [C, A]
    # blocks (the NCHW transpose is folded here, once).
    wh = params["wh"].reshape(mid_n, s_out, action_n)            # [c, s, a]
    wh_taps = jnp.zeros((s_out, c_pad, a_pad), f32)
    wh_taps = wh_taps.at[:, :mid_n, :action_n].set(jnp.transpose(wh, (1, 0, 2)))
    bh_pad = jnp.zeros((1, a_pad), f32).at[:, :action_n].set(params["bh"])

    def pad_c(v):   # BN affine params; gamma padded with 0 keeps pad lanes at 0
        return jnp.zeros((1, c_pad), f32).at[:, :mid_n].set(v)

    # Constant 0/1 gather matrices (host numpy, static shapes only).
    selA = np.zeros((n_taps, m2, m1), np.float32)
    taps = [(kh, kw) for kh in range(w2.shape[0]) for kw in range(w2.shape[1])]
    for t, (kh, kw) in enumerate(taps):
        for n in range(batch_n):
            for oh in range(oh2):
                for ow in range(ow2):
                    r = n * s_out + oh * ow2 + ow
                    c = n * oh1 * ow1 + (2 * oh + kh) * ow1 + (2 * ow + kw)
                    selA[t, r, c] = 1.0
    selB = np.zeros((s_out, batch_n, m2), np.float32)
    for s in range(s_out):
        for n in range(batch_n):
            selB[s, n, n * s_out + s] = 1.0

    # NOTE: params["b1"] / params["b2"] (conv biases) are intentionally NOT
    # used — a per-channel constant added before BatchNorm is cancelled by the
    # mean subtraction, so dropping it is a free, exact simplification.
    return {
        "w1": w1_pad.astype(MATMUL_DTYPE),
        "gamma1": pad_c(params["gamma1"]),
        "beta1": pad_c(params["beta1"]),
        "selA": jnp.asarray(selA, MATMUL_DTYPE),
        "w2": w2_taps.astype(MATMUL_DTYPE),
        "gamma2": pad_c(params["gamma2"]),
        "beta2": pad_c(params["beta2"]),
        "selB": jnp.asarray(selB, MATMUL_DTYPE),
        "wh": wh_taps.astype(MATMUL_DTYPE),
        "bh": bh_pad,
        "a_pad": a_pad,
    }


# ------------------------------ the module --------------------------------- #

def init_params(key, w, h, action_n, mid_n):
    convw = conv2d_size_out(conv2d_size_out(w))
    convh = conv2d_size_out(conv2d_size_out(h))
    linear_in = convw * convh * mid_n
    k1, k2, k3, k4, k5, k6 = jax.random.split(key, 6)
    params = {
        # conv weights stored as [kh, kw, cin, cout] (== torch weight.permute(2,3,1,0))
        "w1": 0.1 * jax.random.normal(k1, (3, 3, 3, mid_n), jnp.float32),
        "b1": 0.1 * jax.random.normal(k2, (1, mid_n), jnp.float32),  # cancelled by BN
        "gamma1": jnp.ones((1, mid_n), jnp.float32),
        "beta1": jnp.zeros((1, mid_n), jnp.float32),
        "w2": 0.1 * jax.random.normal(k3, (3, 3, mid_n, mid_n), jnp.float32),
        "b2": 0.1 * jax.random.normal(k4, (1, mid_n), jnp.float32),  # cancelled by BN
        "gamma2": jnp.ones((1, mid_n), jnp.float32),
        "beta2": jnp.zeros((1, mid_n), jnp.float32),
        # head stored as [F, action_n] (== torch Linear.weight.T), F in NCHW order
        "wh": 0.1 * jax.random.normal(k5, (linear_in, action_n), jnp.float32),
        "bh": 0.1 * jax.random.normal(k6, (1, action_n), jnp.float32),
    }
    return params


def conv_forward(params, x_nchw):
    action_n = params["wh"].shape[-1]
    batch_n, _, h, w = x_nchw.shape

    ops = prepare_kernel_operands(params, batch_n, h, w)

    # Layer-1 im2col on the raw input (stride-2 3x3 'valid', channels-last,
    # columns ordered ((kh,kw) outer, cin inner)).
    # TODO(synk): at Atari-scale inputs, build these patches inside the kernel
    # from NHWC row tiles (pl.ANY + make_async_copy) instead of materializing
    # the 9x-duplicated im2col tensor in HBM.
    x_nhwc = jnp.transpose(x_nchw, (0, 2, 3, 1)).astype(jnp.float32)
    p1, _ = extract_patches(x_nhwc)
    p1 = p1.astype(MATMUL_DTYPE)

    out_pad = pl.pallas_call(
        fused_forward_kernel,
        out_shape=jax.ShapeDtypeStruct((batch_n, ops["a_pad"]), jnp.float32),
        in_specs=[_vmem_spec()] * 11,
        out_specs=_vmem_spec(),
    )(p1, ops["w1"], ops["gamma1"], ops["beta1"],
      ops["selA"], ops["w2"], ops["gamma2"], ops["beta2"],
      ops["selB"], ops["wh"], ops["bh"])

    return out_pad[:, :action_n]


if __name__ == "__main__":
    # Small shapes consistent with the module: batch=2, 3-channel 16x16 frames,
    # mid_n=8 conv channels, action_n=4 (LunarLander-v2 action space).
    N, C, H, W = 2, 3, 16, 16
    mid_n, action_n = 8, 4

    key = jax.random.PRNGKey(0)
    k_param, k_x = jax.random.split(key)
    params = init_params(k_param, W, H, action_n, mid_n)
    x = jax.random.normal(k_x, (N, C, H, W), jnp.float32)

    forward = jax.jit(conv_forward)
    out = forward(params, x)
    out = jax.block_until_ready(out)
    assert out.shape == (N, action_n), out.shape
    print("KERNEL_OK")
</pallas_src>

<mosaic_0001>
module attributes {stable_mosaic.version = 11 : i64} {
  func.func @fused_forward_kernel(%arg0: memref<98x27xf32, #tpu.memory_space<vmem>>, %arg1: memref<27x128xf32, #tpu.memory_space<vmem>>, %arg2: memref<1x128xf32, #tpu.memory_space<vmem>>, %arg3: memref<1x128xf32, #tpu.memory_space<vmem>>, %arg4: memref<9x18x98xf32, #tpu.memory_space<vmem>>, %arg5: memref<9x128x128xf32, #tpu.memory_space<vmem>>, %arg6: memref<1x128xf32, #tpu.memory_space<vmem>>, %arg7: memref<1x128xf32, #tpu.memory_space<vmem>>, %arg8: memref<9x2x18xf32, #tpu.memory_space<vmem>>, %arg9: memref<9x128x128xf32, #tpu.memory_space<vmem>>, %arg10: memref<1x128xf32, #tpu.memory_space<vmem>>, %arg11: memref<2x128xf32, #tpu.memory_space<vmem>>) attributes {dimension_semantics = [], scalar_prefetch = 0 : i64, scratch_operands = 0 : i64, tpu.core_type = #tpu.core_type<tc>} {
    %c0 = arith.constant 0 : index
    %c0_0 = arith.constant 0 : index
    %0 = vector.load %arg0[%c0, %c0_0] : memref<98x27xf32, #tpu.memory_space<vmem>>, vector<98x27xf32>
    %c0_1 = arith.constant 0 : index
    %c0_2 = arith.constant 0 : index
    %1 = vector.load %arg1[%c0_1, %c0_2] : memref<27x128xf32, #tpu.memory_space<vmem>>, vector<27x128xf32>
    %cst = arith.constant dense<0.000000e+00> : vector<98x128xf32>
    %2 = tpu.matmul %0, %1, %cst {dimension_numbers = #tpu.dot_dimension_numbers<[1], [0], [0], [1], [0, 0, 1, 1], [], []>} : vector<98x27xf32>, vector<27x128xf32>, vector<98x128xf32> -> vector<98x128xf32>
    %c0_3 = arith.constant 0 : index
    %c0_4 = arith.constant 0 : index
    %3 = vector.load %arg2[%c0_3, %c0_4] : memref<1x128xf32, #tpu.memory_space<vmem>>, vector<1x128xf32>
    %c0_5 = arith.constant 0 : index
    %c0_6 = arith.constant 0 : index
    %4 = vector.load %arg3[%c0_5, %c0_6] : memref<1x128xf32, #tpu.memory_space<vmem>>, vector<1x128xf32>
    %cst_7 = arith.constant dense<0.000000e+00> : vector<128xf32>
    %5 = vector.multi_reduction <add>, %2, %cst_7 [0] : vector<98x128xf32> to vector<128xf32>
    %6 = vector.shape_cast %5 : vector<128xf32> to vector<1x128xf32>
    %7 = arith.mulf %2, %2 : vector<98x128xf32>
    %cst_8 = arith.constant dense<0.000000e+00> : vector<128xf32>
    %8 = vector.multi_reduction <add>, %7, %cst_8 [0] : vector<98x128xf32> to vector<128xf32>
    %9 = vector.shape_cast %8 : vector<128xf32> to vector<1x128xf32>
    %cst_9 = arith.constant 0.0102040814 : f32
    %10 = vector.broadcast %cst_9 : f32 to vector<1x128xf32>
    %11 = arith.mulf %6, %10 : vector<1x128xf32>
    %cst_10 = arith.constant 0.0102040814 : f32
    %12 = vector.broadcast %cst_10 : f32 to vector<1x128xf32>
    %13 = arith.mulf %9, %12 : vector<1x128xf32>
    %14 = arith.mulf %11, %11 : vector<1x128xf32>
    %15 = arith.subf %13, %14 : vector<1x128xf32>
    %cst_11 = arith.constant 0.000000e+00 : f32
    %16 = vector.broadcast %cst_11 : f32 to vector<1x128xf32>
    %17 = arith.maximumf %15, %16 : vector<1x128xf32>
    %cst_12 = arith.constant 9.99999974E-6 : f32
    %18 = vector.broadcast %cst_12 : f32 to vector<1x128xf32>
    %19 = arith.addf %17, %18 : vector<1x128xf32>
    %20 = math.rsqrt %19 : vector<1x128xf32>
    %21 = arith.mulf %3, %20 : vector<1x128xf32>
    %22 = arith.mulf %11, %21 : vector<1x128xf32>
    %23 = arith.subf %4, %22 : vector<1x128xf32>
    %24 = vector.broadcast %21 : vector<1x128xf32> to vector<98x128xf32>
    %25 = arith.mulf %2, %24 : vector<98x128xf32>
    %26 = vector.broadcast %23 : vector<1x128xf32> to vector<98x128xf32>
    %27 = arith.addf %25, %26 : vector<98x128xf32>
    %cst_13 = arith.constant 0.000000e+00 : f32
    %28 = vector.broadcast %cst_13 : f32 to vector<98x128xf32>
    %29 = arith.maximumf %27, %28 : vector<98x128xf32>
    %cst_14 = arith.constant 0.000000e+00 : f32
    %30 = vector.broadcast %cst_14 : f32 to vector<18x128xf32>
    %c0_15 = arith.constant 0 : index
    %c0_16 = arith.constant 0 : index
    %c0_17 = arith.constant 0 : index
    %31 = vector.load %arg4[%c0_15, %c0_16, %c0_17] : memref<9x18x98xf32, #tpu.memory_space<vmem>>, vector<1x18x98xf32>
    %32 = vector.shape_cast %31 : vector<1x18x98xf32> to vector<18x98xf32>
    %cst_18 = arith.constant dense<0.000000e+00> : vector<18x128xf32>
    %33 = tpu.matmul %32, %29, %cst_18 {dimension_numbers = #tpu.dot_dimension_numbers<[1], [0], [0], [1], [0, 0, 1, 1], [], []>} : vector<18x98xf32>, vector<98x128xf32>, vector<18x128xf32> -> vector<18x128xf32>
    %c0_19 = arith.constant 0 : index
    %c0_20 = arith.constant 0 : index
    %c0_21 = arith.constant 0 : index
    %34 = vector.load %arg5[%c0_19, %c0_20, %c0_21] : memref<9x128x128xf32, #tpu.memory_space<vmem>>, vector<1x128x128xf32>
    %35 = vector.shape_cast %34 : vector<1x128x128xf32> to vector<128x128xf32>
    %cst_22 = arith.constant dense<0.000000e+00> : vector<18x128xf32>
    %36 = tpu.matmul %33, %35, %cst_22 {dimension_numbers = #tpu.dot_dimension_numbers<[1], [0], [0], [1], [0, 0, 1, 1], [], []>} : vector<18x128xf32>, vector<128x128xf32>, vector<18x128xf32> -> vector<18x128xf32>
    %37 = arith.addf %30, %36 : vector<18x128xf32>
    %c1 = arith.constant 1 : index
    %c0_23 = arith.constant 0 : index
    %c0_24 = arith.constant 0 : index
    %38 = vector.load %arg4[%c1, %c0_23, %c0_24] : memref<9x18x98xf32, #tpu.memory_space<vmem>>, vector<1x18x98xf32>
    %39 = vector.shape_cast %38 : vector<1x18x98xf32> to vector<18x98xf32>
    %cst_25 = arith.constant dense<0.000000e+00> : vector<18x128xf32>
    %40 = tpu.matmul %39, %29, %cst_25 {dimension_numbers = #tpu.dot_dimension_numbers<[1], [0], [0], [1], [0, 0, 1, 1], [], []>} : vector<18x98xf32>, vector<98x128xf32>, vector<18x128xf32> -> vector<18x128xf32>
    %c1_26 = arith.constant 1 : index
    %c0_27 = arith.constant 0 : index
    %c0_28 = arith.constant 0 : index
    %41 = vector.load %arg5[%c1_26, %c0_27, %c0_28] : memref<9x128x128xf32, #tpu.memory_space<vmem>>, vector<1x128x128xf32>
    %42 = vector.shape_cast %41 : vector<1x128x128xf32> to vector<128x128xf32>
    %cst_29 = arith.constant dense<0.000000e+00> : vector<18x128xf32>
    %43 = tpu.matmul %40, %42, %cst_29 {dimension_numbers = #tpu.dot_dimension_numbers<[1], [0], [0], [1], [0, 0, 1, 1], [], []>} : vector<18x128xf32>, vector<128x128xf32>, vector<18x128xf32> -> vector<18x128xf32>
    %44 = arith.addf %37, %43 : vector<18x128xf32>
    %c2 = arith.constant 2 : index
    %c0_30 = arith.constant 0 : index
    %c0_31 = arith.constant 0 : index
    %45 = vector.load %arg4[%c2, %c0_30, %c0_31] : memref<9x18x98xf32, #tpu.memory_space<vmem>>, vector<1x18x98xf32>
    %46 = vector.shape_cast %45 : vector<1x18x98xf32> to vector<18x98xf32>
    %cst_32 = arith.constant dense<0.000000e+00> : vector<18x128xf32>
    %47 = tpu.matmul %46, %29, %cst_32 {dimension_numbers = #tpu.dot_dimension_numbers<[1], [0], [0], [1], [0, 0, 1, 1], [], []>} : vector<18x98xf32>, vector<98x128xf32>, vector<18x128xf32> -> vector<18x128xf32>
    %c2_33 = arith.constant 2 : index
    %c0_34 = arith.constant 0 : index
    %c0_35 = arith.constant 0 : index
    %48 = vector.load %arg5[%c2_33, %c0_34, %c0_35] : memref<9x128x128xf32, #tpu.memory_space<vmem>>, vector<1x128x128xf32>
    %49 = vector.shape_cast %48 : vector<1x128x128xf32> to vector<128x128xf32>
    %cst_36 = arith.constant dense<0.000000e+00> : vector<18x128xf32>
    %50 = tpu.matmul %47, %49, %cst_36 {dimension_numbers = #tpu.dot_dimension_numbers<[1], [0], [0], [1], [0, 0, 1, 1], [], []>} : vector<18x128xf32>, vector<128x128xf32>, vector<18x128xf32> -> vector<18x128xf32>
    %51 = arith.addf %44, %50 : vector<18x128xf32>
    %c3 = arith.constant 3 : index
    %c0_37 = arith.constant 0 : index
    %c0_38 = arith.constant 0 : index
    %52 = vector.load %arg4[%c3, %c0_37, %c0_38] : memref<9x18x98xf32, #tpu.memory_space<vmem>>, vector<1x18x98xf32>
    %53 = vector.shape_cast %52 : vector<1x18x98xf32> to vector<18x98xf32>
    %cst_39 = arith.constant dense<0.000000e+00> : vector<18x128xf32>
    %54 = tpu.matmul %53, %29, %cst_39 {dimension_numbers = #tpu.dot_dimension_numbers<[1], [0], [0], [1], [0, 0, 1, 1], [], []>} : vector<18x98xf32>, vector<98x128xf32>, vector<18x128xf32> -> vector<18x128xf32>
    %c3_40 = arith.constant 3 : index
    %c0_41 = arith.constant 0 : index
    %c0_42 = arith.constant 0 : index
    %55 = vector.load %arg5[%c3_40, %c0_41, %c0_42] : memref<9x128x128xf32, #tpu.memory_space<vmem>>, vector<1x128x128xf32>
    %56 = vector.shape_cast %55 : vector<1x128x128xf32> to vector<128x128xf32>
    %cst_43 = arith.constant dense<0.000000e+00> : vector<18x128xf32>
    %57 = tpu.matmul %54, %56, %cst_43 {dimension_numbers = #tpu.dot_dimension_numbers<[1], [0], [0], [1], [0, 0, 1, 1], [], []>} : vector<18x128xf32>, vector<128x128xf32>, vector<18x128xf32> -> vector<18x128xf32>
    %58 = arith.addf %51, %57 : vector<18x128xf32>
    %c4 = arith.constant 4 : index
    %c0_44 = arith.constant 0 : index
    %c0_45 = arith.constant 0 : index
    %59 = vector.load %arg4[%c4, %c0_44, %c0_45] : memref<9x18x98xf32, #tpu.memory_space<vmem>>, vector<1x18x98xf32>
    %60 = vector.shape_cast %59 : vector<1x18x98xf32> to vector<18x98xf32>
    %cst_46 = arith.constant dense<0.000000e+00> : vector<18x128xf32>
    %61 = tpu.matmul %60, %29, %cst_46 {dimension_numbers = #tpu.dot_dimension_numbers<[1], [0], [0], [1], [0, 0, 1, 1], [], []>} : vector<18x98xf32>, vector<98x128xf32>, vector<18x128xf32> -> vector<18x128xf32>
    %c4_47 = arith.constant 4 : index
    %c0_48 = arith.constant 0 : index
    %c0_49 = arith.constant 0 : index
    %62 = vector.load %arg5[%c4_47, %c0_48, %c0_49] : memref<9x128x128xf32, #tpu.memory_space<vmem>>, vector<1x128x128xf32>
    %63 = vector.shape_cast %62 : vector<1x128x128xf32> to vector<128x128xf32>
    %cst_50 = arith.constant dense<0.000000e+00> : vector<18x128xf32>
    %64 = tpu.matmul %61, %63, %cst_50 {dimension_numbers = #tpu.dot_dimension_numbers<[1], [0], [0], [1], [0, 0, 1, 1], [], []>} : vector<18x128xf32>, vector<128x128xf32>, vector<18x128xf32> -> vector<18x128xf32>
    %65 = arith.addf %58, %64 : vector<18x128xf32>
    %c5 = arith.constant 5 : index
    %c0_51 = arith.constant 0 : index
    %c0_52 = arith.constant 0 : index
    %66 = vector.load %arg4[%c5, %c0_51, %c0_52] : memref<9x18x98xf32, #tpu.memory_space<vmem>>, vector<1x18x98xf32>
    %67 = vector.shape_cast %66 : vector<1x18x98xf32> to vector<18x98xf32>
    %cst_53 = arith.constant dense<0.000000e+00> : vector<18x128xf32>
    %68 = tpu.matmul %67, %29, %cst_53 {dimension_numbers = #tpu.dot_dimension_numbers<[1], [0], [0], [1], [0, 0, 1, 1], [], []>} : vector<18x98xf32>, vector<98x128xf32>, vector<18x128xf32> -> vector<18x128xf32>
    %c5_54 = arith.constant 5 : index
    %c0_55 = arith.constant 0 : index
    %c0_56 = arith.constant 0 : index
    %69 = vector.load %arg5[%c5_54, %c0_55, %c0_56] : memref<9x128x128xf32, #tpu.memory_space<vmem>>, vector<1x128x128xf32>
    %70 = vector.shape_cast %69 : vector<1x128x128xf32> to vector<128x128xf32>
    %cst_57 = arith.constant dense<0.000000e+00> : vector<18x128xf32>
    %71 = tpu.matmul %68, %70, %cst_57 {dimension_numbers = #tpu.dot_dimension_numbers<[1], [0], [0], [1], [0, 0, 1, 1], [], []>} : vector<18x128xf32>, vector<128x128xf32>, vector<18x128xf32> -> vector<18x128xf32>
    %72 = arith.addf %65, %71 : vector<18x128xf32>
    %c6 = arith.constant 6 : index
    %c0_58 = arith.constant 0 : index
    %c0_59 = arith.constant 0 : index
    %73 = vector.load %arg4[%c6, %c0_58, %c0_59] : memref<9x18x98xf32, #tpu.memory_space<vmem>>, vector<1x18x98xf32>
    %74 = vector.shape_cast %73 : vector<1x18x98xf32> to vector<18x98xf32>
    %cst_60 = arith.constant dense<0.000000e+00> : vector<18x128xf32>
    %75 = tpu.matmul %74, %29, %cst_60 {dimension_numbers = #tpu.dot_dimension_numbers<[1], [0], [0], [1], [0, 0, 1, 1], [], []>} : vector<18x98xf32>, vector<98x128xf32>, vector<18x128xf32> -> vector<18x128xf32>
    %c6_61 = arith.constant 6 : index
    %c0_62 = arith.constant 0 : index
    %c0_63 = arith.constant 0 : index
    %76 = vector.load %arg5[%c6_61, %c0_62, %c0_63] : memref<9x128x128xf32, #tpu.memory_space<vmem>>, vector<1x128x128xf32>
    %77 = vector.shape_cast %76 : vector<1x128x128xf32> to vector<128x128xf32>
    %cst_64 = arith.constant dense<0.000000e+00> : vector<18x128xf32>
    %78 = tpu.matmul %75, %77, %cst_64 {dimension_numbers = #tpu.dot_dimension_numbers<[1], [0], [0], [1], [0, 0, 1, 1], [], []>} : vector<18x128xf32>, vector<128x128xf32>, vector<18x128xf32> -> vector<18x128xf32>
    %79 = arith.addf %72, %78 : vector<18x128xf32>
    %c7 = arith.constant 7 : index
    %c0_65 = arith.constant 0 : index
    %c0_66 = arith.constant 0 : index
    %80 = vector.load %arg4[%c7, %c0_65, %c0_66] : memref<9x18x98xf32, #tpu.memory_space<vmem>>, vector<1x18x98xf32>
    %81 = vector.shape_cast %80 : vector<1x18x98xf32> to vector<18x98xf32>
    %cst_67 = arith.constant dense<0.000000e+00> : vector<18x128xf32>
    %82 = tpu.matmul %81, %29, %cst_67 {dimension_numbers = #tpu.dot_dimension_numbers<[1], [0], [0], [1], [0, 0, 1, 1], [], []>} : vector<18x98xf32>, vector<98x128xf32>, vector<18x128xf32> -> vector<18x128xf32>
    %c7_68 = arith.constant 7 : index
    %c0_69 = arith.constant 0 : index
    %c0_70 = arith.constant 0 : index
    %83 = vector.load %arg5[%c7_68, %c0_69, %c0_70] : memref<9x128x128xf32, #tpu.memory_space<vmem>>, vector<1x128x128xf32>
    %84 = vector.shape_cast %83 : vector<1x128x128xf32> to vector<128x128xf32>
    %cst_71 = arith.constant dense<0.000000e+00> : vector<18x128xf32>
    %85 = tpu.matmul %82, %84, %cst_71 {dimension_numbers = #tpu.dot_dimension_numbers<[1], [0], [0], [1], [0, 0, 1, 1], [], []>} : vector<18x128xf32>, vector<128x128xf32>, vector<18x128xf32> -> vector<18x128xf32>
    %86 = arith.addf %79, %85 : vector<18x128xf32>
    %c8 = arith.constant 8 : index
    %c0_72 = arith.constant 0 : index
    %c0_73 = arith.constant 0 : index
    %87 = vector.load %arg4[%c8, %c0_72, %c0_73] : memref<9x18x98xf32, #tpu.memory_space<vmem>>, vector<1x18x98xf32>
    %88 = vector.shape_cast %87 : vector<1x18x98xf32> to vector<18x98xf32>
    %cst_74 = arith.constant dense<0.000000e+00> : vector<18x128xf32>
    %89 = tpu.matmul %88, %29, %cst_74 {dimension_numbers = #tpu.dot_dimension_numbers<[1], [0], [0], [1], [0, 0, 1, 1], [], []>} : vector<18x98xf32>, vector<98x128xf32>, vector<18x128xf32> -> vector<18x128xf32>
    %c8_75 = arith.constant 8 : index
    %c0_76 = arith.constant 0 : index
    %c0_77 = arith.constant 0 : index
    %90 = vector.load %arg5[%c8_75, %c0_76, %c0_77] : memref<9x128x128xf32, #tpu.memory_space<vmem>>, vector<1x128x128xf32>
    %91 = vector.shape_cast %90 : vector<1x128x128xf32> to vector<128x128xf32>
    %cst_78 = arith.constant dense<0.000000e+00> : vector<18x128xf32>
    %92 = tpu.matmul %89, %91, %cst_78 {dimension_numbers = #tpu.dot_dimension_numbers<[1], [0], [0], [1], [0, 0, 1, 1], [], []>} : vector<18x128xf32>, vector<128x128xf32>, vector<18x128xf32> -> vector<18x128xf32>
    %93 = arith.addf %86, %92 : vector<18x128xf32>
    %c0_79 = arith.constant 0 : index
    %c0_80 = arith.constant 0 : index
    %94 = vector.load %arg6[%c0_79, %c0_80] : memref<1x128xf32, #tpu.memory_space<vmem>>, vector<1x128xf32>
    %c0_81 = arith.constant 0 : index
    %c0_82 = arith.constant 0 : index
    %95 = vector.load %arg7[%c0_81, %c0_82] : memref<1x128xf32, #tpu.memory_space<vmem>>, vector<1x128xf32>
    %cst_83 = arith.constant dense<0.000000e+00> : vector<128xf32>
    %96 = vector.multi_reduction <add>, %93, %cst_83 [0] : vector<18x128xf32> to vector<128xf32>
    %97 = vector.shape_cast %96 : vector<128xf32> to vector<1x128xf32>
    %98 = arith.mulf %93, %93 : vector<18x128xf32>
    %cst_84 = arith.constant dense<0.000000e+00> : vector<128xf32>
    %99 = vector.multi_reduction <add>, %98, %cst_84 [0] : vector<18x128xf32> to vector<128xf32>
    %100 = vector.shape_cast %99 : vector<128xf32> to vector<1x128xf32>
    %cst_85 = arith.constant 0.055555556 : f32
    %101 = vector.broadcast %cst_85 : f32 to vector<1x128xf32>
    %102 = arith.mulf %97, %101 : vector<1x128xf32>
    %cst_86 = arith.constant 0.055555556 : f32
    %103 = vector.broadcast %cst_86 : f32 to vector<1x128xf32>
    %104 = arith.mulf %100, %103 : vector<1x128xf32>
    %105 = arith.mulf %102, %102 : vector<1x128xf32>
    %106 = arith.subf %104, %105 : vector<1x128xf32>
    %cst_87 = arith.constant 0.000000e+00 : f32
    %107 = vector.broadcast %cst_87 : f32 to vector<1x128xf32>
    %108 = arith.maximumf %106, %107 : vector<1x128xf32>
    %cst_88 = arith.constant 9.99999974E-6 : f32
    %109 = vector.broadcast %cst_88 : f32 to vector<1x128xf32>
    %110 = arith.addf %108, %109 : vector<1x128xf32>
    %111 = math.rsqrt %110 : vector<1x128xf32>
    %112 = arith.mulf %94, %111 : vector<1x128xf32>
    %113 = arith.mulf %102, %112 : vector<1x128xf32>
    %114 = arith.subf %95, %113 : vector<1x128xf32>
    %115 = vector.broadcast %112 : vector<1x128xf32> to vector<18x128xf32>
    %116 = arith.mulf %93, %115 : vector<18x128xf32>
    %117 = vector.broadcast %114 : vector<1x128xf32> to vector<18x128xf32>
    %118 = arith.addf %116, %117 : vector<18x128xf32>
    %cst_89 = arith.constant 0.000000e+00 : f32
    %119 = vector.broadcast %cst_89 : f32 to vector<18x128xf32>
    %120 = arith.maximumf %118, %119 : vector<18x128xf32>
    %cst_90 = arith.constant 0.000000e+00 : f32
    %121 = vector.broadcast %cst_90 : f32 to vector<2x128xf32>
    %c0_91 = arith.constant 0 : index
    %c0_92 = arith.constant 0 : index
    %c0_93 = arith.constant 0 : index
    %122 = vector.load %arg8[%c0_91, %c0_92, %c0_93] : memref<9x2x18xf32, #tpu.memory_space<vmem>>, vector<1x2x18xf32>
    %123 = vector.shape_cast %122 : vector<1x2x18xf32> to vector<2x18xf32>
    %cst_94 = arith.constant dense<0.000000e+00> : vector<2x128xf32>
    %124 = tpu.matmul %123, %120, %cst_94 {dimension_numbers = #tpu.dot_dimension_numbers<[1], [0], [0], [1], [0, 0, 1, 1], [], []>} : vector<2x18xf32>, vector<18x128xf32>, vector<2x128xf32> -> vector<2x128xf32>
    %c0_95 = arith.constant 0 : index
    %c0_96 = arith.constant 0 : index
    %c0_97 = arith.constant 0 : index
    %125 = vector.load %arg9[%c0_95, %c0_96, %c0_97] : memref<9x128x128xf32, #tpu.memory_space<vmem>>, vector<1x128x128xf32>
    %126 = vector.shape_cast %125 : vector<1x128x128xf32> to vector<128x128xf32>
    %cst_98 = arith.constant dense<0.000000e+00> : vector<2x128xf32>
    %127 = tpu.matmul %124, %126, %cst_98 {dimension_numbers = #tpu.dot_dimension_numbers<[1], [0], [0], [1], [0, 0, 1, 1], [], []>} : vector<2x128xf32>, vector<128x128xf32>, vector<2x128xf32> -> vector<2x128xf32>
    %128 = arith.addf %121, %127 : vector<2x128xf32>
    %c1_99 = arith.constant 1 : index
    %c0_100 = arith.constant 0 : index
    %c0_101 = arith.constant 0 : index
    %129 = vector.load %arg8[%c1_99, %c0_100, %c0_101] : memref<9x2x18xf32, #tpu.memory_space<vmem>>, vector<1x2x18xf32>
    %130 = vector.shape_cast %129 : vector<1x2x18xf32> to vector<2x18xf32>
    %cst_102 = arith.constant dense<0.000000e+00> : vector<2x128xf32>
    %131 = tpu.matmul %130, %120, %cst_102 {dimension_numbers = #tpu.dot_dimension_numbers<[1], [0], [0], [1], [0, 0, 1, 1], [], []>} : vector<2x18xf32>, vector<18x128xf32>, vector<2x128xf32> -> vector<2x128xf32>
    %c1_103 = arith.constant 1 : index
    %c0_104 = arith.constant 0 : index
    %c0_105 = arith.constant 0 : index
    %132 = vector.load %arg9[%c1_103, %c0_104, %c0_105] : memref<9x128x128xf32, #tpu.memory_space<vmem>>, vector<1x128x128xf32>
    %133 = vector.shape_cast %132 : vector<1x128x128xf32> to vector<128x128xf32>
    %cst_106 = arith.constant dense<0.000000e+00> : vector<2x128xf32>
    %134 = tpu.matmul %131, %133, %cst_106 {dimension_numbers = #tpu.dot_dimension_numbers<[1], [0], [0], [1], [0, 0, 1, 1], [], []>} : vector<2x128xf32>, vector<128x128xf32>, vector<2x128xf32> -> vector<2x128xf32>
    %135 = arith.addf %128, %134 : vector<2x128xf32>
    %c2_107 = arith.constant 2 : index
    %c0_108 = arith.constant 0 : index
    %c0_109 = arith.constant 0 : index
    %136 = vector.load %arg8[%c2_107, %c0_108, %c0_109] : memref<9x2x18xf32, #tpu.memory_space<vmem>>, vector<1x2x18xf32>
    %137 = vector.shape_cast %136 : vector<1x2x18xf32> to vector<2x18xf32>
    %cst_110 = arith.constant dense<0.000000e+00> : vector<2x128xf32>
    %138 = tpu.matmul %137, %120, %cst_110 {dimension_numbers = #tpu.dot_dimension_numbers<[1], [0], [0], [1], [0, 0, 1, 1], [], []>} : vector<2x18xf32>, vector<18x128xf32>, vector<2x128xf32> -> vector<2x128xf32>
    %c2_111 = arith.constant 2 : index
    %c0_112 = arith.constant 0 : index
    %c0_113 = arith.constant 0 : index
    %139 = vector.load %arg9[%c2_111, %c0_112, %c0_113] : memref<9x128x128xf32, #tpu.memory_space<vmem>>, vector<1x128x128xf32>
    %140 = vector.shape_cast %139 : vector<1x128x128xf32> to vector<128x128xf32>
    %cst_114 = arith.constant dense<0.000000e+00> : vector<2x128xf32>
    %141 = tpu.matmul %138, %140, %cst_114 {dimension_numbers = #tpu.dot_dimension_numbers<[1], [0], [0], [1], [0, 0, 1, 1], [], []>} : vector<2x128xf32>, vector<128x128xf32>, vector<2x128xf32> -> vector<2x128xf32>
    %142 = arith.addf %135, %141 : vector<2x128xf32>
    %c3_115 = arith.constant 3 : index
    %c0_116 = arith.constant 0 : index
    %c0_117 = arith.constant 0 : index
    %143 = vector.load %arg8[%c3_115, %c0_116, %c0_117] : memref<9x2x18xf32, #tpu.memory_space<vmem>>, vector<1x2x18xf32>
    %144 = vector.shape_cast %143 : vector<1x2x18xf32> to vector<2x18xf32>
    %cst_118 = arith.constant dense<0.000000e+00> : vector<2x128xf32>
    %145 = tpu.matmul %144, %120, %cst_118 {dimension_numbers = #tpu.dot_dimension_numbers<[1], [0], [0], [1], [0, 0, 1, 1], [], []>} : vector<2x18xf32>, vector<18x128xf32>, vector<2x128xf32> -> vector<2x128xf32>
    %c3_119 = arith.constant 3 : index
    %c0_120 = arith.constant 0 : index
    %c0_121 = arith.constant 0 : index
    %146 = vector.load %arg9[%c3_119, %c0_120, %c0_121] : memref<9x128x128xf32, #tpu.memory_space<vmem>>, vector<1x128x128xf32>
    %147 = vector.shape_cast %146 : vector<1x128x128xf32> to vector<128x128xf32>
    %cst_122 = arith.constant dense<0.000000e+00> : vector<2x128xf32>
    %148 = tpu.matmul %145, %147, %cst_122 {dimension_numbers = #tpu.dot_dimension_numbers<[1], [0], [0], [1], [0, 0, 1, 1], [], []>} : vector<2x128xf32>, vector<128x128xf32>, vector<2x128xf32> -> vector<2x128xf32>
    %149 = arith.addf %142, %148 : vector<2x128xf32>
    %c4_123 = arith.constant 4 : index
    %c0_124 = arith.constant 0 : index
    %c0_125 = arith.constant 0 : index
    %150 = vector.load %arg8[%c4_123, %c0_124, %c0_125] : memref<9x2x18xf32, #tpu.memory_space<vmem>>, vector<1x2x18xf32>
    %151 = vector.shape_cast %150 : vector<1x2x18xf32> to vector<2x18xf32>
    %cst_126 = arith.constant dense<0.000000e+00> : vector<2x128xf32>
    %152 = tpu.matmul %151, %120, %cst_126 {dimension_numbers = #tpu.dot_dimension_numbers<[1], [0], [0], [1], [0, 0, 1, 1], [], []>} : vector<2x18xf32>, vector<18x128xf32>, vector<2x128xf32> -> vector<2x128xf32>
    %c4_127 = arith.constant 4 : index
    %c0_128 = arith.constant 0 : index
    %c0_129 = arith.constant 0 : index
    %153 = vector.load %arg9[%c4_127, %c0_128, %c0_129] : memref<9x128x128xf32, #tpu.memory_space<vmem>>, vector<1x128x128xf32>
    %154 = vector.shape_cast %153 : vector<1x128x128xf32> to vector<128x128xf32>
    %cst_130 = arith.constant dense<0.000000e+00> : vector<2x128xf32>
    %155 = tpu.matmul %152, %154, %cst_130 {dimension_numbers = #tpu.dot_dimension_numbers<[1], [0], [0], [1], [0, 0, 1, 1], [], []>} : vector<2x128xf32>, vector<128x128xf32>, vector<2x128xf32> -> vector<2x128xf32>
    %156 = arith.addf %149, %155 : vector<2x128xf32>
    %c5_131 = arith.constant 5 : index
    %c0_132 = arith.constant 0 : index
    %c0_133 = arith.constant 0 : index
    %157 = vector.load %arg8[%c5_131, %c0_132, %c0_133] : memref<9x2x18xf32, #tpu.memory_space<vmem>>, vector<1x2x18xf32>
    %158 = vector.shape_cast %157 : vector<1x2x18xf32> to vector<2x18xf32>
    %cst_134 = arith.constant dense<0.000000e+00> : vector<2x128xf32>
    %159 = tpu.matmul %158, %120, %cst_134 {dimension_numbers = #tpu.dot_dimension_numbers<[1], [0], [0], [1], [0, 0, 1, 1], [], []>} : vector<2x18xf32>, vector<18x128xf32>, vector<2x128xf32> -> vector<2x128xf32>
    %c5_135 = arith.constant 5 : index
    %c0_136 = arith.constant 0 : index
    %c0_137 = arith.constant 0 : index
    %160 = vector.load %arg9[%c5_135, %c0_136, %c0_137] : memref<9x128x128xf32, #tpu.memory_space<vmem>>, vector<1x128x128xf32>
    %161 = vector.shape_cast %160 : vector<1x128x128xf32> to vector<128x128xf32>
    %cst_138 = arith.constant dense<0.000000e+00> : vector<2x128xf32>
    %162 = tpu.matmul %159, %161, %cst_138 {dimension_numbers = #tpu.dot_dimension_numbers<[1], [0], [0], [1], [0, 0, 1, 1], [], []>} : vector<2x128xf32>, vector<128x128xf32>, vector<2x128xf32> -> vector<2x128xf32>
    %163 = arith.addf %156, %162 : vector<2x128xf32>
    %c6_139 = arith.constant 6 : index
    %c0_140 = arith.constant 0 : index
    %c0_141 = arith.constant 0 : index
    %164 = vector.load %arg8[%c6_139, %c0_140, %c0_141] : memref<9x2x18xf32, #tpu.memory_space<vmem>>, vector<1x2x18xf32>
    %165 = vector.shape_cast %164 : vector<1x2x18xf32> to vector<2x18xf32>
    %cst_142 = arith.constant dense<0.000000e+00> : vector<2x128xf32>
    %166 = tpu.matmul %165, %120, %cst_142 {dimension_numbers = #tpu.dot_dimension_numbers<[1], [0], [0], [1], [0, 0, 1, 1], [], []>} : vector<2x18xf32>, vector<18x128xf32>, vector<2x128xf32> -> vector<2x128xf32>
    %c6_143 = arith.constant 6 : index
    %c0_144 = arith.constant 0 : index
    %c0_145 = arith.constant 0 : index
    %167 = vector.load %arg9[%c6_143, %c0_144, %c0_145] : memref<9x128x128xf32, #tpu.memory_space<vmem>>, vector<1x128x128xf32>
    %168 = vector.shape_cast %167 : vector<1x128x128xf32> to vector<128x128xf32>
    %cst_146 = arith.constant dense<0.000000e+00> : vector<2x128xf32>
    %169 = tpu.matmul %166, %168, %cst_146 {dimension_numbers = #tpu.dot_dimension_numbers<[1], [0], [0], [1], [0, 0, 1, 1], [], []>} : vector<2x128xf32>, vector<128x128xf32>, vector<2x128xf32> -> vector<2x128xf32>
    %170 = arith.addf %163, %169 : vector<2x128xf32>
    %c7_147 = arith.constant 7 : index
    %c0_148 = arith.constant 0 : index
    %c0_149 = arith.constant 0 : index
    %171 = vector.load %arg8[%c7_147, %c0_148, %c0_149] : memref<9x2x18xf32, #tpu.memory_space<vmem>>, vector<1x2x18xf32>
    %172 = vector.shape_cast %171 : vector<1x2x18xf32> to vector<2x18xf32>
    %cst_150 = arith.constant dense<0.000000e+00> : vector<2x128xf32>
    %173 = tpu.matmul %172, %120, %cst_150 {dimension_numbers = #tpu.dot_dimension_numbers<[1], [0], [0], [1], [0, 0, 1, 1], [], []>} : vector<2x18xf32>, vector<18x128xf32>, vector<2x128xf32> -> vector<2x128xf32>
    %c7_151 = arith.constant 7 : index
    %c0_152 = arith.constant 0 : index
    %c0_153 = arith.constant 0 : index
    %174 = vector.load %arg9[%c7_151, %c0_152, %c0_153] : memref<9x128x128xf32, #tpu.memory_space<vmem>>, vector<1x128x128xf32>
    %175 = vector.shape_cast %174 : vector<1x128x128xf32> to vector<128x128xf32>
    %cst_154 = arith.constant dense<0.000000e+00> : vector<2x128xf32>
    %176 = tpu.matmul %173, %175, %cst_154 {dimension_numbers = #tpu.dot_dimension_numbers<[1], [0], [0], [1], [0, 0, 1, 1], [], []>} : vector<2x128xf32>, vector<128x128xf32>, vector<2x128xf32> -> vector<2x128xf32>
    %177 = arith.addf %170, %176 : vector<2x128xf32>
    %c8_155 = arith.constant 8 : index
    %c0_156 = arith.constant 0 : index
    %c0_157 = arith.constant 0 : index
    %178 = vector.load %arg8[%c8_155, %c0_156, %c0_157] : memref<9x2x18xf32, #tpu.memory_space<vmem>>, vector<1x2x18xf32>
    %179 = vector.shape_cast %178 : vector<1x2x18xf32> to vector<2x18xf32>
    %cst_158 = arith.constant dense<0.000000e+00> : vector<2x128xf32>
    %180 = tpu.matmul %179, %120, %cst_158 {dimension_numbers = #tpu.dot_dimension_numbers<[1], [0], [0], [1], [0, 0, 1, 1], [], []>} : vector<2x18xf32>, vector<18x128xf32>, vector<2x128xf32> -> vector<2x128xf32>
    %c8_159 = arith.constant 8 : index
    %c0_160 = arith.constant 0 : index
    %c0_161 = arith.constant 0 : index
    %181 = vector.load %arg9[%c8_159, %c0_160, %c0_161] : memref<9x128x128xf32, #tpu.memory_space<vmem>>, vector<1x128x128xf32>
    %182 = vector.shape_cast %181 : vector<1x128x128xf32> to vector<128x128xf32>
    %cst_162 = arith.constant dense<0.000000e+00> : vector<2x128xf32>
    %183 = tpu.matmul %180, %182, %cst_162 {dimension_numbers = #tpu.dot_dimension_numbers<[1], [0], [0], [1], [0, 0, 1, 1], [], []>} : vector<2x128xf32>, vector<128x128xf32>, vector<2x128xf32> -> vector<2x128xf32>
    %184 = arith.addf %177, %183 : vector<2x128xf32>
    %c0_163 = arith.constant 0 : index
    %c0_164 = arith.constant 0 : index
    %185 = vector.load %arg10[%c0_163, %c0_164] : memref<1x128xf32, #tpu.memory_space<vmem>>, vector<1x128xf32>
    %186 = vector.broadcast %185 : vector<1x128xf32> to vector<2x128xf32>
    %187 = arith.addf %184, %186 : vector<2x128xf32>
    %c0_165 = arith.constant 0 : index
    %c0_166 = arith.constant 0 : index
    %188 = vector.load %arg11[%c0_165, %c0_166] : memref<2x128xf32, #tpu.memory_space<vmem>>, vector<2x128xf32>
    tpu.vector_store %arg11[%c0_165, %c0_166], %187 {strides = array<i32>} : memref<2x128xf32, #tpu.memory_space<vmem>>, vector<2x128xf32>,
    return
  }
}

</mosaic_0001>

<bundles_post_ra>
// kernel: conv_forward.1
= control target key start
LH: loop header
LB: loop body
LE: loop exit
PB: predicated region body
PF: predicated region fallthrough
CT: control target
= control target key end

     0   :  { %vm96_vm0 = vcmask 1042432   ;;  %v6340_v3 = vmov 0.0|0.0   ;;  %vm6341_vm1 = vmmov 0   ;;  %v6342_v6 = vmov 0.0   ;;  %s8181_s0 = inlined_call_operand.vmem [shape: f32[98,27], index: 0, kind: input, shape index: {}]   ;;  %s8182_s1 = inlined_call_operand.vmem [shape: f32[27,128], index: 1, kind: input, shape index: {}]   ;;  %s8183_s2 = inlined_call_operand.vmem [shape: f32[1,128], index: 2, kind: input, shape index: {}]   ;;  %s8184_s3 = inlined_call_operand.vmem [shape: f32[1,128], index: 3, kind: input, shape index: {}]   ;;  %s8185_s4 = inlined_call_operand.vmem [shape: f32[9,18,98], index: 4, kind: input, shape index: {}]   ;;  %s8186_s5 = inlined_call_operand.vmem [shape: f32[9,128,128], index: 5, kind: input, shape index: {}]   ;;  %s8187_s6 = inlined_call_operand.vmem [shape: f32[1,128], index: 6, kind: input, shape index: {}]   ;;  %s8188_s7 = inlined_call_operand.vmem [shape: f32[1,128], index: 7, kind: input, shape index: {}]   ;;  %s8189_s8 = inlined_call_operand.vmem [shape: f32[9,2,18], index: 8, kind: input, shape index: {}]   ;;  %s8190_s9 = inlined_call_operand.vmem [shape: f32[9,128,128], index: 9, kind: input, shape index: {}]   ;;  %s8191_s10 = inlined_call_operand.vmem [shape: f32[1,128], index: 10, kind: input, shape index: {}]   ;;  %s8192_s11 = inlined_call_operand.hbm [shape: f32[2,128], index: 11, kind: output, shape index: {}]  }
   0x1   :  { %v52_v0 = vld [vmem:[%s8182_s1] sm:$0xff]  ;;  %v53_v1 = vld [vmem:[%s8182_s1 + $0x8] sm:$0xff]  ;;  %v54_v2 = vld [vmem:[%s8182_s1 + $0x10] sm:$0xff]  ;;  %5627 = vmatprep.subr.bf16.mxu0 %v6340_v3  ;;  %6255 = vmatprep.subr.bf16.mxu1 %v6340_v3  ;;  %vm6343_vm2 = vmmov 1  }
   0x2   :  { %v5628_v4 = vpack.c.bf16 %v53_v1, %v52_v0  ;;  %v55_v5 = vld [vmem:[%s8182_s1 + $0x18] sm:$0x7]  ;;  %4508 = vmatprep.mubr.msk.f32.mxu0 %vm6341_vm1, %v6342_v6  ;;  %4532 = vmatprep.mubr.msk.f32.mxu1 %vm6341_vm1, %v6342_v6  ;;  %vm5632_vm3 = vmpackc.low %vm96_vm0, %vm6343_vm2 }
   0x3   :  { %v5631_v7 = vpack.c.bf16 %v55_v5, %v54_v2 }
   0x4   :  { %5629 = vmatpush3.bf16.msra.mxu0 %v5628_v4  ;;  %6257 = vmatpush3.bf16.msra.mxu1 %v5628_v4 }
   0x5   :  { %5630 = vmatprep.subr.bf16.mxu0 %v6340_v3  ;;  %6256 = vmatprep.subr.bf16.mxu1 %v6340_v3 }
   0x6   :  { %16 = vsyncpa [#allocation3], 0  ;;  %v39_v8 = vld [vmem:[%s8181_s0] sm:$0xff]  ;;  %vm56_vm4 = vcmask 220160   ;;  %v40_v10 = vld [vmem:[%s8181_s0 + $0x8] sm:$0xff]  ;;  %vm243_vm5 = vcmask 1041408  }
   0x7   :  { %v47_v9 = vld [vmem:[%s8181_s0 + $0x40] sm:$0xff]  ;;  %v48_v11 = vld [vmem:[%s8181_s0 + $0x48] sm:$0xff]  ;;  %v41_v12 = vld [vmem:[%s8181_s0 + $0x10] sm:$0xff]  ;;  %vm348_vm6 = vcmask 801792   ;;  %vm2133_vm7 = vcmask 146432   ;;  %s6344_s30 = smov [#allocation2]  }
   0x8   :  { %5633 = vmatpush3.bf16.msk.msra.mxu0 %vm5632_vm3, %v5631_v7  ;;  %6258 = vmatpush3.bf16.msk.msra.mxu1 %vm5632_vm3, %v5631_v7  ;;  %v49_v13 = vld [vmem:[%s8181_s0 + $0x50] sm:$0xff]  ;;  %v42_v14 = vld [vmem:[%s8181_s0 + $0x18] sm:$0xff]  ;;  %v43_v16 = vld [vmem:[%s8181_s0 + $0x20] sm:$0xff] }
   0x9   :  { %5634 = vmatprep.subr.bf16.mxu1 %v6340_v3  ;;  %5670 = vmatprep.subr.bf16.mxu0 %v6340_v3  ;;  %v50_v15 = vld [vmem:[%s8181_s0 + $0x58] sm:$0xff]  ;;  %v51_v17 = vld [vmem:[%s8181_s0 + $0x60] sm:$0x3]  ;;  %v44_v18 = vld [vmem:[%s8181_s0 + $0x28] sm:$0xff] }
   0xa   :  { %v45_v19 = vld [vmem:[%s8181_s0 + $0x30] sm:$0xff]  ;;  %v46_v20 = vld [vmem:[%s8181_s0 + $0x38] sm:$0xff] }
   0xb   :  { %4509 = vmatmul.mubr.msk.f32.vlgmr.msra.gmra.mrb[0].mxu0 %vm56_vm4, %v39_v8  ;;  %4533 = vmatmul.mubr.msk.f32.vlgmr.msra.gmra.mrb[0].mxu1 %vm56_vm4, %v47_v9 }
   0xc   :  { %4511 = vmatprep.mubr.msk.f32.mxu0 %vm6341_vm1, %v6342_v6  ;;  %4535 = vmatprep.mubr.msk.f32.mxu1 %vm6341_vm1, %v6342_v6 }
   0xf   :  { %4512 = vmatmul.mubr.msk.f32.gmra.mrb[2].mxu0 %vm56_vm4, %v40_v10  ;;  %4536 = vmatmul.mubr.msk.f32.gmra.mrb[2].mxu1 %vm56_vm4, %v48_v11 }
  0x10   :  { %4514 = vmatprep.mubr.msk.f32.mxu0 %vm6341_vm1, %v6342_v6  ;;  %4538 = vmatprep.mubr.msk.f32.mxu1 %vm6341_vm1, %v6342_v6 }
  0x13   :  { %4515 = vmatmul.mubr.msk.f32.gmra.mrb[4].mxu0 %vm56_vm4, %v41_v12  ;;  %4539 = vmatmul.mubr.msk.f32.gmra.mrb[4].mxu1 %vm56_vm4, %v49_v13 }
  0x14   :  { %4517 = vmatprep.mubr.msk.f32.mxu0 %vm6341_vm1, %v6342_v6  ;;  %4541 = vmatprep.mubr.msk.f32.mxu1 %vm6341_vm1, %v6342_v6 }
  0x17   :  { %4518 = vmatmul.mubr.msk.f32.gmra.mrb[6].mxu0 %vm56_vm4, %v42_v14  ;;  %4542 = vmatmul.mubr.msk.f32.gmra.mrb[6].mxu1 %vm56_vm4, %v50_v15 }
  0x18   :  { %4520 = vmatprep.mubr.msk.f32.mxu0 %vm6341_vm1, %v6342_v6  ;;  %4544 = vmatprep.mubr.msk.f32.mxu1 %vm6341_vm1, %v6342_v6 }
  0x1b   :  { %4521 = vmatmul.mubr.msk.f32.gmra.mrb[8].mxu0 %vm56_vm4, %v43_v16  ;;  %4545 = vmatmul.mubr.msk.f32.gmra.mrb[8].mxu1 %vm56_vm4, %v51_v17 }
  0x1c   :  { %4523 = vmatprep.mubr.msk.f32.mxu0 %vm6341_vm1, %v6342_v6  ;;  %4573 = vmatprep.mubr.msk.f32.mxu1 %vm6341_vm1, %v6342_v6 }
  0x1f   :  { %4524 = vmatmul.mubr.msk.f32.gmra.mrb[10].mxu0 %vm56_vm4, %v44_v18 }
  0x20   :  { %4526 = vmatprep.mubr.msk.f32.mxu0 %vm6341_vm1, %v6342_v6 }
  0x23   :  { %4527 = vmatmul.mubr.msk.f32.gmra.mrb[12].mxu0 %vm56_vm4, %v45_v19 }
  0x24   :  { %4529 = vmatprep.mubr.msk.f32.mxu0 %vm6341_vm1, %v6342_v6 }
  0x27   :  { %4530 = vmatmul.mubr.msk.f32.gmra.mrb[14].mxu0 %vm56_vm4, %v46_v20 }
  0x28   :  { %4649 = vmatprep.mubr.msk.f32.mxu0 %vm6341_vm1, %v6342_v6 }
  0xde   :  { %v6506_v21 = vpop.f32.mrb[0].mxu0  ;;  %v6508_v22 = vpop.f32.mrb[0].mxu1 }
  0xdf   :  { %v4510_v23 = vpop.f32.mrb[1].mxu0  ;;  %v4534_v24 = vpop.f32.mrb[1].mxu1  ;;  %v252_v27 = vmul.f32 %v6506_v21, %v6506_v21  ;;  %v260_v5 = vmul.f32 %v6508_v22, %v6508_v22 }
  0xe2   :  { %v6510_v25 = vpop.f32.mrb[2].mxu0  ;;  %v6512_v26 = vpop.f32.mrb[2].mxu1 }
  0xe3   :  { %v232_v28 = vadd.f32 %v6510_v25, %v6506_v21  ;;  %v253_v29 = vmul.f32 %v6510_v25, %v6510_v25  ;;  %v4513_v30 = vpop.f32.mrb[3].mxu0  ;;  %v4537_v31 = vpop.f32.mrb[3].mxu1  ;;  %v261_v9 = vmul.f32 %v6512_v26, %v6512_v26 }
  0xe5   :  { %v265_v32 = vadd.f32 %v253_v29, %v252_v27 }
  0xe6   :  { %v6520_v33 = vpop.f32.mrb[4].mxu0  ;;  %v6522_v34 = vpop.f32.mrb[4].mxu1 }
  0xe7   :  { %v233_v35 = vadd.f32 %v232_v28, %v6520_v33  ;;  %v254_v36 = vmul.f32 %v6520_v33, %v6520_v33  ;;  %v4516_v37 = vpop.f32.mrb[5].mxu0  ;;  %v4540_v38 = vpop.f32.mrb[5].mxu1  ;;  %v262_v14 = vmul.f32 %v6522_v34, %v6522_v34 }
  0xe9   :  { %v266_v39 = vadd.f32 %v265_v32, %v254_v36 }
  0xea   :  { %v6527_v40 = vpop.f32.mrb[6].mxu0  ;;  %v6529_v41 = vpop.f32.mrb[6].mxu1 }
  0xeb   :  { %v234_v42 = vadd.f32 %v233_v35, %v6527_v40  ;;  %v255_v43 = vmul.f32 %v6527_v40, %v6527_v40  ;;  %v4519_v44 = vpop.f32.mrb[7].mxu0  ;;  %v4543_v45 = vpop.f32.mrb[7].mxu1  ;;  %v263_v19 = vmul.f32 %v6529_v41, %v6529_v41 }
  0xed   :  { %v267_v46 = vadd.f32 %v266_v39, %v255_v43 }
  0xee   :  { %v6534_v47 = vpop.f32.mrb[8].mxu0  ;;  %v6536_v48 = vpop.f32.mrb[8].mxu1 }
  0xef   :  { %v235_v49 = vadd.f32 %v234_v42, %v6534_v47  ;;  %v256_v50 = vmul.f32 %v6534_v47, %v6534_v47  ;;  %v4522_v51 = vpop.f32.mrb[9].mxu0  ;;  %v4546_v52 = vpop.f32.mrb[9].mxu1  ;;  %v264_v12 = vmul.f32 %v6536_v48, %v6536_v48  ;;  %v244_v16 = vsel %vm243_vm5, %v6536_v48, 0.0 }
  0xf0   :  { %v295_v52 = vlaneseq }
  0xf1   :  { %v268_v53 = vadd.f32 %v267_v46, %v256_v50  ;;  %v276_v20 = vsel %vm243_vm5, %v264_v12, 0.0 }
  0xf2   :  { %v6541_v54 = vpop.f32.mrb[10].mxu0 }
  0xf3   :  { %v236_v55 = vadd.f32 %v235_v49, %v6541_v54  ;;  %v257_v56 = vmul.f32 %v6541_v54, %v6541_v54  ;;  %v4525_v57 = vpop.f32.mrb[11].mxu0 }
  0xf5   :  { %v269_v58 = vadd.f32 %v268_v53, %v257_v56  ;;  %v296_v53 = vshrl.u32 %v295_v52, 7  ;;  %v3663_v52 = vld [vmem:[%s8185_s4 + $0x30] sm:$0xff] }
  0xf6   :  { %v6546_v59 = vpop.f32.mrb[12].mxu0 }
  0xf7   :  { %v237_v60 = vadd.f32 %v236_v55, %v6546_v59  ;;  %v258_v61 = vmul.f32 %v6546_v59, %v6546_v59  ;;  %v4528_v62 = vpop.f32.mrb[13].mxu0  ;;  %v230_v55 = vld [vmem:[%s8183_s2] sm:$0x1]  ;;  %v6571_v56 = vsub.s32 0, %v296_v53  ;;  %v3664_v53 = vld [vmem:[%s8185_s4 + $0x38] sm:$0xff] }
  0xf9   :  { %v270_v63 = vadd.f32 %v269_v58, %v258_v61 }
  0xfa   :  { %v201_v0 = vpop.f32.mrb[14].mxu0 }
  0xfb   :  { %v238_v1 = vadd.f32 %v237_v60, %v201_v0  ;;  %v259_v2 = vmul.f32 %v201_v0, %v201_v0  ;;  %v4531_v4 = vpop.f32.mrb[15].mxu0  ;;  %v231_v60 = vld [vmem:[%s8184_s3] sm:$0x1] }
  0xfd   :  { %v239_v7 = vadd.f32 %v238_v1, %v6508_v22  ;;  %v271_v8 = vadd.f32 %v270_v63, %v259_v2 }
  0xff   :  { %v272_v10 = vadd.f32 %v271_v8, %v260_v5  ;;  %v240_v11 = vadd.f32 %v239_v7, %v6512_v26 }
 0x101   :  { %v241_v13 = vadd.f32 %v240_v11, %v6522_v34  ;;  %v273_v15 = vadd.f32 %v272_v10, %v261_v9 }
 0x103   :  { %v274_v17 = vadd.f32 %v273_v15, %v262_v14  ;;  %v242_v18 = vadd.f32 %v241_v13, %v6529_v41 }
 0x105   :  { %v275_v23 = vadd.f32 %v274_v17, %v263_v19  ;;  %v245_v24 = vadd.f32 %v244_v16, %v242_v18 }
 0x107   :  { %v246_v27 = vrot.slane %v245_v24, 4  ;;  %v277_v28 = vadd.f32 %v276_v20, %v275_v23 }
 0x109   :  { %v247_v29 = vadd.f32 %v246_v27, %v245_v24  ;;  %v278_v30 = vrot.slane %v277_v28, 4 }
 0x10b   :  { %v248_v31 = vrot.slane %v247_v29, 2  ;;  %v279_v32 = vadd.f32 %v278_v30, %v277_v28 }
 0x10d   :  { %v249_v35 = vadd.f32 %v248_v31, %v247_v29  ;;  %v280_v36 = vrot.slane %v279_v32, 2 }
 0x10f   :  { %v250_v37 = vrot.slane %v249_v35, 1  ;;  %v281_v38 = vadd.f32 %v280_v36, %v279_v32 }
 0x111   :  { %v251_v39 = vadd.f32 %v250_v37, %v249_v35  ;;  %v282_v42 = vrot.slane %v281_v38, 1 }
 0x113   :  { %v283_v43 = vadd.f32 %v282_v42, %v281_v38  ;;  %v284_v44 = vmul.f32 0.010204081, %v251_v39 }
 0x115   :  { %v285_v45 = vmul.f32 0.010204081, %v283_v43  ;;  %v286_v46 = vmul.f32 %v284_v44, %v284_v44 }
 0x117   :  { %v287_v49 = vsub.f32 %v285_v45, %v286_v46  ;;  %v346_v45 = vld [vmem:[%s8185_s4 + $0x8] sm:$0xff]  ;;  %v347_v46 = vld [vmem:[%s8185_s4 + $0x10] sm:$0x3] }
 0x119   :  { %v288_v50 = vmax.f32 %v287_v49, 0.0  ;;  %v3640_v49 = vld [vmem:[%s8185_s4 + $0x18] sm:$0xff] }
 0x11b   :  { %v289_v51 = vadd.f32 1e-05, %v288_v50  ;;  %v3641_v50 = vld [vmem:[%s8185_s4 + $0x20] sm:$0xff] }
 0x11d   :  { %6312 = vrsqrt.f32 %v289_v51  ;;  %v3642_v51 = vld [vmem:[%s8185_s4 + $0x28] sm:$0x3] }
 0x127   :  { %v6313_v57 = vpop.eup %6312 }
 0x128   :  { %v291_v58 = vmul.f32 %v6313_v57, %v230_v55  ;;  %v3665_v55 = vld [vmem:[%s8185_s4 + $0x40] sm:$0x3]  ;;  %v3686_v57 = vld [vmem:[%s8185_s4 + $0x48] sm:$0xff] }
 0x12a   :  { %v292_v61 = vmul.f32 %v291_v58, %v284_v44  ;;  %v298_v62 = vrot.slane %v291_v58, %v6571_v56  ;;  %v345_v44 = vld [vmem:[%s8185_s4] sm:$0xff] }
 0x12b   :  { %v3647_v58 = vld [vmem:[%s8186_s5 + $0x80] sm:$0xff] }
 0x12c   :  { %v293_v63 = vsub.f32 %v231_v60, %v292_v61  ;;  %v312_v1 = vmul.f32 %v298_v62, %v6536_v48  ;;  %v300_v2 = vmul.f32 %v298_v62, %v6506_v21  ;;  %v301_v4 = vmul.f32 %v298_v62, %v6510_v25  ;;  %v3648_v60 = vld [vmem:[%s8186_s5 + $0x88] sm:$0xff] }
 0x12d   :  { %v302_v5 = vmul.f32 %v298_v62, %v6520_v33  ;;  %v303_v7 = vmul.f32 %v298_v62, %v6527_v40  ;;  %v304_v8 = vmul.f32 %v298_v62, %v6534_v47  ;;  %v305_v9 = vmul.f32 %v298_v62, %v6541_v54 }
 0x12e   :  { %v317_v10 = vrot.slane %v293_v63, %v6571_v56  ;;  %v306_v11 = vmul.f32 %v298_v62, %v6546_v59  ;;  %v307_v12 = vmul.f32 %v298_v62, %v201_v0  ;;  %v308_v13 = vmul.f32 %v298_v62, %v6508_v22  ;;  %v3649_v63 = vld [vmem:[%s8186_s5 + $0x90] sm:$0xff] }
 0x12f   :  { %v309_v48 = vmul.f32 %v298_v62, %v6512_v26  ;;  %v310_v21 = vmul.f32 %v298_v62, %v6522_v34  ;;  %v311_v25 = vmul.f32 %v298_v62, %v6529_v41  ;;  %v5671_v61 = vpack.c.bf16 %v3648_v60, %v3647_v58  ;;  %v3687_v62 = vld [vmem:[%s8185_s4 + $0x50] sm:$0xff]  ;;  %v448_v58 = vld [vmem:[%s8186_s5 + $0x38] sm:$0xff] }
 0x130   :  { %v331_v33 = vadd.f32 %v317_v10, %v312_v1  ;;  %v319_v14 = vadd.f32 %v317_v10, %v300_v2  ;;  %v320_v40 = vadd.f32 %v317_v10, %v301_v4  ;;  %v321_v15 = vadd.f32 %v317_v10, %v302_v5  ;;  %v3650_v1 = vld [vmem:[%s8186_s5 + $0x98] sm:$0xff]  ;;  %v3651_v5 = vld [vmem:[%s8186_s5 + $0xa0] sm:$0xff] }
 0x131   :  { %v322_v47 = vadd.f32 %v317_v10, %v303_v7  ;;  %v323_v16 = vadd.f32 %v317_v10, %v304_v8  ;;  %v324_v54 = vadd.f32 %v317_v10, %v305_v9  ;;  %v325_v17 = vadd.f32 %v317_v10, %v306_v11  ;;  %5672 = vmatpush3.bf16.msra.mxu0 %v5671_v61  ;;  %v3688_v4 = vld [vmem:[%s8185_s4 + $0x58] sm:$0x3]  ;;  %v3652_v7 = vld [vmem:[%s8186_s5 + $0xa8] sm:$0xff]  ;;  %v3653_v9 = vld [vmem:[%s8186_s5 + $0xb0] sm:$0xff] }
 0x132   :  { %v332_v18 = vmax.f32 %v319_v14, 0.0  ;;  %v333_v19 = vmax.f32 %v320_v40, 0.0  ;;  %v334_v59 = vmax.f32 %v321_v15, 0.0  ;;  %v326_v23 = vadd.f32 %v317_v10, %v307_v12  ;;  %5673 = vmatprep.subr.bf16.mxu0 %v6340_v3  ;;  %v3655_v12 = vld [vmem:[%s8186_s5 + $0xc0] sm:$0xff]  ;;  %v3660_v40 = vld [vmem:[%s8186_s5 + $0xe8] sm:$0xff] }
 0x133   :  { %v335_v0 = vmax.f32 %v322_v47, 0.0  ;;  %v336_v20 = vmax.f32 %v323_v16, 0.0  ;;  %v337_v22 = vmax.f32 %v324_v54, 0.0  ;;  %v338_v34 = vmax.f32 %v325_v17, 0.0  ;;  %v3659_v14 = vld [vmem:[%s8186_s5 + $0xe0] sm:$0xff]  ;;  %v3661_v16 = vld [vmem:[%s8186_s5 + $0xf0] sm:$0xff] }
 0x134   :  { %v6590_v26 = vpack.c.bf16 %v333_v19, %v332_v18  ;;  %v327_v24 = vadd.f32 %v317_v10, %v308_v13  ;;  %v328_v41 = vadd.f32 %v317_v10, %v309_v48  ;;  %v339_v29 = vmax.f32 %v326_v23, 0.0  ;;  %v3656_v13 = vld [vmem:[%s8186_s5 + $0xc8] sm:$0xff]  ;;  %v3709_v15 = vld [vmem:[%s8185_s4 + $0x60] sm:$0xff]  ;;  %v3662_v54 = vld [vmem:[%s8186_s5 + $0xf8] sm:$0xff] }
 0x135   :  { %v6592_v27 = vpack.c.bf16 %v335_v0, %v334_v59  ;;  %v6594_v28 = vpack.c.bf16 %v337_v22, %v336_v20  ;;  %v329_v30 = vadd.f32 %v317_v10, %v310_v21  ;;  %v330_v35 = vadd.f32 %v317_v10, %v311_v25  ;;  %v3654_v10 = vld [vmem:[%s8186_s5 + $0xb8] sm:$0xff]  ;;  %v3657_v21 = vld [vmem:[%s8186_s5 + $0xd0] sm:$0xff]  ;;  %v3710_v17 = vld [vmem:[%s8185_s4 + $0x68] sm:$0xff] }
 0x136   :  { %5636 = vmatpush3.bf16.msra.mxu1 %v6590_v26  ;;  %v340_v31 = vmax.f32 %v327_v24, 0.0  ;;  %v341_v32 = vmax.f32 %v328_v41, 0.0  ;;  %v6598_v36 = vpack.c.bf16 %v339_v29, %v338_v34  ;;  %v6614_v43 = vmax.f32 %v331_v33, 0.0  ;;  %v3658_v25 = vld [vmem:[%s8186_s5 + $0xd8] sm:$0xff]  ;;  %v3711_v19 = vld [vmem:[%s8185_s4 + $0x70] sm:$0x3] }
 0x137   :  { %5637 = vmatprep.subr.bf16.mxu1 %v6340_v3  ;;  %v342_v37 = vmax.f32 %v329_v30, 0.0  ;;  %v343_v39 = vmax.f32 %v330_v35, 0.0  ;;  %v5674_v2 = vpack.c.bf16 %v3650_v1, %v3649_v63  ;;  %v5677_v8 = vpack.c.bf16 %v3652_v7, %v3651_v5  ;;  %v3732_v59 = vld [vmem:[%s8185_s4 + $0x78] sm:$0xff]  ;;  %v3733_v0 = vld [vmem:[%s8185_s4 + $0x80] sm:$0xff]  ;;  %v3734_v20 = vld [vmem:[%s8185_s4 + $0x88] sm:$0x3] }
 0x138   :  { %v6600_v38 = vpack.c.bf16 %v341_v32, %v340_v31  ;;  %v5680_v11 = vpack.c.bf16 %v3654_v10, %v3653_v9  ;;  %v5683_v48 = vpack.c.bf16 %v3656_v13, %v3655_v12  ;;  %v5686_v33 = vpack.c.bf16 %v3658_v25, %v3657_v21  ;;  %v3755_v22 = vld [vmem:[%s8185_s4 + $0x90] sm:$0xff]  ;;  %v3756_v23 = vld [vmem:[%s8185_s4 + $0x98] sm:$0xff]  ;;  %v3757_v34 = vld [vmem:[%s8185_s4 + $0xa0] sm:$0x3] }
 0x139   :  { %v6603_v42 = vpack.c.bf16 %v343_v39, %v342_v37  ;;  %5675 = vmatpush3.bf16.msra.mxu0 %v5674_v2  ;;  %v5689_v47 = vpack.c.bf16 %v3660_v40, %v3659_v14  ;;  %v5692_v18 = vpack.c.bf16 %v3662_v54, %v3661_v16  ;;  %v3778_v24 = vld [vmem:[%s8185_s4 + $0xa8] sm:$0xff]  ;;  %v3779_v41 = vld [vmem:[%s8185_s4 + $0xb0] sm:$0xff]  ;;  %v449_v63 = vld [vmem:[%s8186_s5 + $0x40] sm:$0xff] }
 0x13a   :  { %5639 = vmatpush3.bf16.msra.mxu1 %v6592_v27  ;;  %5676 = vmatprep.subr.bf16.mxu0 %v6340_v3  ;;  %v3803_v31 = vld [vmem:[%s8185_s4 + $0xd0] sm:$0x3]  ;;  %v442_v39 = vld [vmem:[%s8186_s5 + $0x8] sm:$0xff]  ;;  %v452_v5 = vld [vmem:[%s8186_s5 + $0x58] sm:$0xff] }
 0x13b   :  { %5640 = vmatprep.subr.bf16.mxu1 %v6340_v3  ;;  %v450_v1 = vld [vmem:[%s8186_s5 + $0x48] sm:$0xff]  ;;  %v456_v12 = vld [vmem:[%s8186_s5 + $0x78] sm:$0xff]  ;;  %v3670_v21 = vld [vmem:[%s8186_s5 + $0x100] sm:$0xff] }
 0x13c   :  { %v5707_v2 = vpack.c.bf16 %v450_v1, %v449_v63  ;;  %v454_v9 = vld [vmem:[%s8186_s5 + $0x68] sm:$0xff] }
 0x13d   :  { %5678 = vmatpush3.bf16.msra.mxu0 %v5677_v8  ;;  %v453_v8 = vld [vmem:[%s8186_s5 + $0x60] sm:$0xff]  ;;  %v3671_v25 = vld [vmem:[%s8186_s5 + $0x108] sm:$0xff] }
 0x13e   :  { %5642 = vmatpush3.bf16.msra.mxu1 %v6594_v28  ;;  %5679 = vmatprep.subr.bf16.mxu0 %v6340_v3  ;;  %v5713_v10 = vpack.c.bf16 %v454_v9, %v453_v8  ;;  %v5737_v14 = vpack.c.bf16 %v3671_v25, %v3670_v21  ;;  %v3702_v63 = vld [vmem:[%s8186_s5 + $0x1c8] sm:$0xff]  ;;  %v3707_v21 = vld [vmem:[%s8186_s5 + $0x1f0] sm:$0xff]  ;;  %v3708_v25 = vld [vmem:[%s8186_s5 + $0x1f8] sm:$0xff] }
 0x13f   :  { %5643 = vmatprep.subr.bf16.mxu1 %v6340_v3 }
 0x141   :  { %5681 = vmatpush3.bf16.msra.mxu0 %v5680_v11  ;;  %v455_v11 = vld [vmem:[%s8186_s5 + $0x70] sm:$0xff] }
 0x142   :  { %5645 = vmatpush3.bf16.msra.mxu1 %v6598_v36  ;;  %5682 = vmatprep.subr.bf16.mxu0 %v6340_v3  ;;  %v5716_v13 = vpack.c.bf16 %v456_v12, %v455_v11  ;;  %v3706_v11 = vld [vmem:[%s8186_s5 + $0x1e8] sm:$0xff] }
 0x143   :  { %5646 = vmatprep.subr.bf16.mxu1 %v6340_v3 }
 0x145   :  { %5684 = vmatpush3.bf16.msra.mxu0 %v5683_v48 }
 0x146   :  { %5648 = vmatpush3.bf16.msra.mxu1 %v6600_v38  ;;  %5685 = vmatprep.subr.bf16.mxu0 %v6340_v3 }
 0x147   :  { %5649 = vmatprep.subr.bf16.mxu1 %v6340_v3 }
 0x149   :  { %5687 = vmatpush3.bf16.msra.mxu0 %v5686_v33 }
 0x14a   :  { %5651 = vmatpush3.bf16.msra.mxu1 %v6603_v42  ;;  %5688 = vmatprep.subr.bf16.mxu0 %v6340_v3 }
 0x14b   :  { %4571 = vmatprep.subr.mxu1 %v6342_v6 }
 0x14d   :  { %5690 = vmatpush3.bf16.msra.mxu0 %v5689_v47  ;;  %v3673_v47 = vld [vmem:[%s8186_s5 + $0x118] sm:$0xff] }
 0x14e   :  { %4572 = vmatpush3.msk.msra.mxu1 %vm243_vm5, %v6614_v43  ;;  %5691 = vmatprep.subr.bf16.mxu0 %v6340_v3 }
 0x14f   :  { %4574 = vmatmul.mubr.msk.f32.vlgmr.msra.gmra.mrb[10].mxu1 %vm348_vm6, %v345_v44  ;;  %5652 = vmatprep.subr.bf16.mxu1 %v6340_v3  ;;  %v444_v44 = vld [vmem:[%s8186_s5 + $0x18] sm:$0xff] }
 0x150   :  { %5654 = vmatpush3.bf16.msra.mxu1 %v6590_v26  ;;  %4576 = vmatprep.mubr.msk.f32.mxu1 %vm6341_vm1, %v6342_v6 }
 0x151   :  { %5655 = vmatprep.subr.bf16.mxu1 %v6340_v3  ;;  %5693 = vmatpush3.bf16.msra.mxu0 %v5692_v18  ;;  %v3674_v18 = vld [vmem:[%s8186_s5 + $0x120] sm:$0xff] }
 0x152   :  { %5694 = vmatprep.subr.bf16.mxu0 %v6340_v3 }
 0x153   :  { %4577 = vmatmul.mubr.msk.f32.gmra.mrb[12].mxu1 %vm348_vm6, %v346_v45 }
 0x154   :  { %5657 = vmatpush3.bf16.msra.mxu1 %v6592_v27  ;;  %4579 = vmatprep.mubr.msk.f32.mxu1 %vm6341_vm1, %v6342_v6 }
 0x155   :  { %5658 = vmatprep.subr.bf16.mxu1 %v6340_v3 }
 0x157   :  { %4580 = vmatmul.mubr.msk.f32.gmra.mrb[14].mxu1 %vm348_vm6, %v347_v46 }
 0x158   :  { %5660 = vmatpush3.bf16.msra.mxu1 %v6594_v28  ;;  %4608 = vmatprep.mubr.msk.f32.mxu1 %vm6341_vm1, %v6342_v6 }
 0x159   :  { %5661 = vmatprep.subr.bf16.mxu1 %v6340_v3 }
 0x15c   :  { %5663 = vmatpush3.bf16.msra.mxu1 %v6598_v36 }
 0x15d   :  { %5664 = vmatprep.subr.bf16.mxu1 %v6340_v3 }
 0x160   :  { %5666 = vmatpush3.bf16.msra.mxu1 %v6600_v38 }
 0x161   :  { %5667 = vmatprep.subr.bf16.mxu1 %v6340_v3 }
 0x164   :  { %5669 = vmatpush3.bf16.msra.mxu1 %v6603_v42 }
 0x165   :  { %4606 = vmatprep.subr.mxu1 %v6342_v6 }
 0x168   :  { %4607 = vmatpush3.msk.msra.mxu1 %vm243_vm5, %v6614_v43 }
 0x169   :  { %4609 = vmatmul.mubr.msk.f32.vlgmr.msra.gmra.mrb[16].mxu1 %vm348_vm6, %v3640_v49  ;;  %5718 = vmatprep.subr.bf16.mxu1 %v6340_v3 }
 0x16a   :  { %5720 = vmatpush3.bf16.msra.mxu1 %v6590_v26  ;;  %4611 = vmatprep.mubr.msk.f32.mxu1 %vm6341_vm1, %v6342_v6 }
 0x16b   :  { %5721 = vmatprep.subr.bf16.mxu1 %v6340_v3 }
 0x16d   :  { %4612 = vmatmul.mubr.msk.f32.gmra.mrb[18].mxu1 %vm348_vm6, %v3641_v50  ;;  %v445_v50 = vld [vmem:[%s8186_s5 + $0x20] sm:$0xff] }
 0x16e   :  { %5723 = vmatpush3.bf16.msra.mxu1 %v6592_v27  ;;  %4614 = vmatprep.mubr.msk.f32.mxu1 %vm6341_vm1, %v6342_v6 }
 0x16f   :  { %5724 = vmatprep.subr.bf16.mxu1 %v6340_v3 }
 0x171   :  { %4615 = vmatmul.mubr.msk.f32.gmra.mrb[20].mxu1 %vm348_vm6, %v3642_v51  ;;  %v446_v51 = vld [vmem:[%s8186_s5 + $0x28] sm:$0xff] }
 0x172   :  { %5726 = vmatpush3.bf16.msra.mxu1 %v6594_v28  ;;  %4725 = vmatprep.mubr.msk.f32.mxu1 %vm6341_vm1, %v6342_v6 }
 0x173   :  { %5727 = vmatprep.subr.bf16.mxu1 %v6340_v3 }
 0x176   :  { %5729 = vmatpush3.bf16.msra.mxu1 %v6598_v36 }
 0x177   :  { %5730 = vmatprep.subr.bf16.mxu1 %v6340_v3 }
 0x17a   :  { %5732 = vmatpush3.bf16.msra.mxu1 %v6600_v38 }
 0x17b   :  { %5733 = vmatprep.subr.bf16.mxu1 %v6340_v3 }
 0x17e   :  { %5735 = vmatpush3.bf16.msra.mxu1 %v6603_v42 }
 0x17f   :  { %4723 = vmatprep.subr.mxu1 %v6342_v6 }
 0x182   :  { %4724 = vmatpush3.msk.msra.mxu1 %vm243_vm5, %v6614_v43 }
 0x183   :  { %5760 = vmatprep.subr.bf16.mxu1 %v6340_v3  ;;  %4726 = vmatmul.mubr.msk.f32.vlgmr.msra.gmra.mrb[22].mxu1 %vm348_vm6, %v3663_v52 }
 0x184   :  { %5762 = vmatpush3.bf16.msra.mxu1 %v6590_v26  ;;  %4728 = vmatprep.mubr.msk.f32.mxu1 %vm6341_vm1, %v6342_v6 }
 0x185   :  { %5763 = vmatprep.subr.bf16.mxu1 %v6340_v3 }
 0x187   :  { %4729 = vmatmul.mubr.msk.f32.gmra.mrb[24].mxu1 %vm348_vm6, %v3664_v53 }
 0x188   :  { %5765 = vmatpush3.bf16.msra.mxu1 %v6592_v27  ;;  %4731 = vmatprep.mubr.msk.f32.mxu1 %vm6341_vm1, %v6342_v6 }
 0x189   :  { %5766 = vmatprep.subr.bf16.mxu1 %v6340_v3 }
 0x18b   :  { %4732 = vmatmul.mubr.msk.f32.gmra.mrb[26].mxu1 %vm348_vm6, %v3665_v55  ;;  %v5701_v55 = vpack.c.bf16 %v446_v51, %v445_v50  ;;  %v3695_v50 = vld [vmem:[%s8186_s5 + $0x190] sm:$0xff]  ;;  %v3696_v51 = vld [vmem:[%s8186_s5 + $0x198] sm:$0xff] }
 0x18c   :  { %5768 = vmatpush3.bf16.msra.mxu1 %v6594_v28  ;;  %4801 = vmatprep.mubr.msk.f32.mxu1 %vm6341_vm1, %v6342_v6 }
 0x18d   :  { %5769 = vmatprep.subr.bf16.mxu1 %v6340_v3 }
 0x190   :  { %5771 = vmatpush3.bf16.msra.mxu1 %v6598_v36 }
 0x191   :  { %5772 = vmatprep.subr.bf16.mxu1 %v6340_v3 }
 0x194   :  { %5774 = vmatpush3.bf16.msra.mxu1 %v6600_v38 }
 0x195   :  { %5775 = vmatprep.subr.bf16.mxu1 %v6340_v3 }
 0x198   :  { %5777 = vmatpush3.bf16.msra.mxu1 %v6603_v42 }
 0x199   :  { %4799 = vmatprep.subr.mxu1 %v6342_v6 }
 0x19c   :  { %4800 = vmatpush3.msk.msra.mxu1 %vm243_vm5, %v6614_v43 }
 0x19d   :  { %5802 = vmatprep.subr.bf16.mxu1 %v6340_v3  ;;  %4802 = vmatmul.mubr.msk.f32.vlgmr.msra.gmra.mrb[28].mxu1 %vm348_vm6, %v3686_v57  ;;  %v447_v57 = vld [vmem:[%s8186_s5 + $0x30] sm:$0xff] }
 0x19e   :  { %5804 = vmatpush3.bf16.msra.mxu1 %v6590_v26  ;;  %4804 = vmatprep.mubr.msk.f32.mxu1 %vm6341_vm1, %v6342_v6 }
 0x19f   :  { %5805 = vmatprep.subr.bf16.mxu1 %v6340_v3 }
 0x1a1   :  { %4805 = vmatmul.mubr.msk.f32.gmra.mrb[30].mxu1 %vm348_vm6, %v3687_v62  ;;  %v5704_v62 = vpack.c.bf16 %v448_v58, %v447_v57  ;;  %v3699_v58 = vld [vmem:[%s8186_s5 + $0x1b0] sm:$0xff] }
 0x1a2   :  { %5807 = vmatpush3.bf16.msra.mxu1 %v6592_v27  ;;  %4807 = vmatprep.mubr.msk.f32.mxu1 %vm6341_vm1, %v6342_v6 }
 0x1a3   :  { %5808 = vmatprep.subr.bf16.mxu1 %v6340_v3 }
 0x1a5   :  { %4808 = vmatmul.mubr.msk.f32.gmra.mrb[32].mxu1 %vm348_vm6, %v3688_v4  ;;  %v451_v4 = vld [vmem:[%s8186_s5 + $0x50] sm:$0xff] }
 0x1a6   :  { %5810 = vmatpush3.bf16.msra.mxu1 %v6594_v28  ;;  %4877 = vmatprep.mubr.msk.f32.mxu1 %vm6341_vm1, %v6342_v6  ;;  %v5710_v7 = vpack.c.bf16 %v452_v5, %v451_v4  ;;  %v3703_v4 = vld [vmem:[%s8186_s5 + $0x1d0] sm:$0xff]  ;;  %v3704_v5 = vld [vmem:[%s8186_s5 + $0x1d8] sm:$0xff] }
 0x1a7   :  { %5811 = vmatprep.subr.bf16.mxu1 %v6340_v3  ;;  %v5794_v8 = vpack.c.bf16 %v3704_v5, %v3703_v4  ;;  %v3747_v4 = vld [vmem:[%s8186_s5 + $0x2c0] sm:$0xff]  ;;  %v3748_v5 = vld [vmem:[%s8186_s5 + $0x2c8] sm:$0xff] }
 0x1aa   :  { %5813 = vmatpush3.bf16.msra.mxu1 %v6598_v36 }
 0x1ab   :  { %5814 = vmatprep.subr.bf16.mxu1 %v6340_v3 }
 0x1ae   :  { %5816 = vmatpush3.bf16.msra.mxu1 %v6600_v38 }
 0x1af   :  { %5817 = vmatprep.subr.bf16.mxu1 %v6340_v3 }
 0x1b2   :  { %5819 = vmatpush3.bf16.msra.mxu1 %v6603_v42 }
 0x1b3   :  { %4875 = vmatprep.subr.mxu1 %v6342_v6 }
 0x1b6   :  { %4876 = vmatpush3.msk.msra.mxu1 %vm243_vm5, %v6614_v43 }
 0x1b7   :  { %5844 = vmatprep.subr.bf16.mxu1 %v6340_v3  ;;  %4878 = vmatmul.mubr.msk.f32.vlgmr.msra.gmra.mrb[34].mxu1 %vm348_vm6, %v3709_v15  ;;  %v3672_v15 = vld [vmem:[%s8186_s5 + $0x110] sm:$0xff] }
 0x1b8   :  { %5846 = vmatpush3.bf16.msra.mxu1 %v6590_v26  ;;  %4880 = vmatprep.mubr.msk.f32.mxu1 %vm6341_vm1, %v6342_v6  ;;  %v5740_v54 = vpack.c.bf16 %v3673_v47, %v3672_v15  ;;  %v3717_v15 = vld [vmem:[%s8186_s5 + $0x208] sm:$0xff] }
 0x1b9   :  { %5847 = vmatprep.subr.bf16.mxu1 %v6340_v3 }
 0x1bb   :  { %4881 = vmatmul.mubr.msk.f32.gmra.mrb[36].mxu1 %vm348_vm6, %v3710_v17 }
 0x1bc   :  { %5849 = vmatpush3.bf16.msra.mxu1 %v6592_v27  ;;  %4883 = vmatprep.mubr.msk.f32.mxu1 %vm6341_vm1, %v6342_v6 }
 0x1bd   :  { %5850 = vmatprep.subr.bf16.mxu1 %v6340_v3 }
 0x1bf   :  { %4884 = vmatmul.mubr.msk.f32.gmra.mrb[38].mxu1 %vm348_vm6, %v3711_v19  ;;  %v3675_v19 = vld [vmem:[%s8186_s5 + $0x128] sm:$0xff] }
 0x1c0   :  { %5852 = vmatpush3.bf16.msra.mxu1 %v6594_v28  ;;  %4953 = vmatprep.mubr.msk.f32.mxu1 %vm6341_vm1, %v6342_v6 }
 0x1c1   :  { %5853 = vmatprep.subr.bf16.mxu1 %v6340_v3 }
 0x1c4   :  { %5855 = vmatpush3.bf16.msra.mxu1 %v6598_v36 }
 0x1c5   :  { %5856 = vmatprep.subr.bf16.mxu1 %v6340_v3 }
 0x1c8   :  { %5858 = vmatpush3.bf16.msra.mxu1 %v6600_v38 }
 0x1c9   :  { %5859 = vmatprep.subr.bf16.mxu1 %v6340_v3 }
 0x1cc   :  { %5861 = vmatpush3.bf16.msra.mxu1 %v6603_v42 }
 0x1cd   :  { %4951 = vmatprep.subr.mxu1 %v6342_v6 }
 0x1d0   :  { %4952 = vmatpush3.msk.msra.mxu1 %vm243_vm5, %v6614_v43 }
 0x1d1   :  { %5886 = vmatprep.subr.bf16.mxu1 %v6340_v3  ;;  %4954 = vmatmul.mubr.msk.f32.vlgmr.msra.gmra.mrb[40].mxu1 %vm348_vm6, %v3732_v59 }
 0x1d2   :  { %5888 = vmatpush3.bf16.msra.mxu1 %v6590_v26  ;;  %4956 = vmatprep.mubr.msk.f32.mxu1 %vm6341_vm1, %v6342_v6 }
 0x1d3   :  { %5889 = vmatprep.subr.bf16.mxu1 %v6340_v3 }
 0x1d5   :  { %4957 = vmatmul.mubr.msk.f32.gmra.mrb[42].mxu1 %vm348_vm6, %v3733_v0  ;;  %v5743_v0 = vpack.c.bf16 %v3675_v19, %v3674_v18  ;;  %v3720_v18 = vld [vmem:[%s8186_s5 + $0x220] sm:$0xff]  ;;  %v3721_v19 = vld [vmem:[%s8186_s5 + $0x228] sm:$0xff] }
 0x1d6   :  { %5891 = vmatpush3.bf16.msra.mxu1 %v6592_v27  ;;  %4959 = vmatprep.mubr.msk.f32.mxu1 %vm6341_vm1, %v6342_v6 }
 0x1d7   :  { %5892 = vmatprep.subr.bf16.mxu1 %v6340_v3 }
 0x1d9   :  { %4960 = vmatmul.mubr.msk.f32.gmra.mrb[44].mxu1 %vm348_vm6, %v3734_v20  ;;  %v3676_v20 = vld [vmem:[%s8186_s5 + $0x130] sm:$0xff] }
 0x1da   :  { %5894 = vmatpush3.bf16.msra.mxu1 %v6594_v28  ;;  %5029 = vmatprep.mubr.msk.f32.mxu1 %vm6341_vm1, %v6342_v6 }
 0x1db   :  { %5895 = vmatprep.subr.bf16.mxu1 %v6340_v3 }
 0x1de   :  { %5897 = vmatpush3.bf16.msra.mxu1 %v6598_v36 }
 0x1df   :  { %5898 = vmatprep.subr.bf16.mxu1 %v6340_v3 }
 0x1e2   :  { %5900 = vmatpush3.bf16.msra.mxu1 %v6600_v38 }
 0x1e3   :  { %5901 = vmatprep.subr.bf16.mxu1 %v6340_v3 }
 0x1e6   :  { %5903 = vmatpush3.bf16.msra.mxu1 %v6603_v42 }
 0x1e7   :  { %5027 = vmatprep.subr.mxu1 %v6342_v6 }
 0x1ea   :  { %5028 = vmatpush3.msk.msra.mxu1 %vm243_vm5, %v6614_v43 }
 0x1eb   :  { %5928 = vmatprep.subr.bf16.mxu1 %v6340_v3  ;;  %5030 = vmatmul.mubr.msk.f32.vlgmr.msra.gmra.mrb[46].mxu1 %vm348_vm6, %v3755_v22  ;;  %v3677_v22 = vld [vmem:[%s8186_s5 + $0x138] sm:$0xff] }
 0x1ec   :  { %5930 = vmatpush3.bf16.msra.mxu1 %v6590_v26  ;;  %5032 = vmatprep.mubr.msk.f32.mxu1 %vm6341_vm1, %v6342_v6 }
 0x1ed   :  { %5931 = vmatprep.subr.bf16.mxu1 %v6340_v3 }
 0x1ef   :  { %5033 = vmatmul.mubr.msk.f32.gmra.mrb[48].mxu1 %vm348_vm6, %v3756_v23  ;;  %v5746_v23 = vpack.c.bf16 %v3677_v22, %v3676_v20  ;;  %v3723_v20 = vld [vmem:[%s8186_s5 + $0x238] sm:$0xff] }
 0x1f0   :  { %5933 = vmatpush3.bf16.msra.mxu1 %v6592_v27  ;;  %5035 = vmatprep.mubr.msk.f32.mxu1 %vm6341_vm1, %v6342_v6 }
 0x1f1   :  { %5934 = vmatprep.subr.bf16.mxu1 %v6340_v3 }
 0x1f3   :  { %5036 = vmatmul.mubr.msk.f32.gmra.mrb[50].mxu1 %vm348_vm6, %v3757_v34  ;;  %v3678_v34 = vld [vmem:[%s8186_s5 + $0x140] sm:$0xff] }
 0x1f4   :  { %5936 = vmatpush3.bf16.msra.mxu1 %v6594_v28  ;;  %5105 = vmatprep.mubr.msk.f32.mxu1 %vm6341_vm1, %v6342_v6 }
 0x1f5   :  { %5937 = vmatprep.subr.bf16.mxu1 %v6340_v3 }
 0x1f8   :  { %5939 = vmatpush3.bf16.msra.mxu1 %v6598_v36 }
 0x1f9   :  { %5940 = vmatprep.subr.bf16.mxu1 %v6340_v3 }
 0x1fc   :  { %5942 = vmatpush3.bf16.msra.mxu1 %v6600_v38 }
 0x1fd   :  { %5943 = vmatprep.subr.bf16.mxu1 %v6340_v3 }
 0x200   :  { %5945 = vmatpush3.bf16.msra.mxu1 %v6603_v42 }
 0x201   :  { %5103 = vmatprep.subr.mxu1 %v6342_v6 }
 0x204   :  { %5104 = vmatpush3.msk.msra.mxu1 %vm243_vm5, %v6614_v43 }
 0x205   :  { %5970 = vmatprep.subr.bf16.mxu1 %v6340_v3  ;;  %5106 = vmatmul.mubr.msk.f32.vlgmr.msra.gmra.mrb[52].mxu1 %vm348_vm6, %v3778_v24  ;;  %v3679_v24 = vld [vmem:[%s8186_s5 + $0x148] sm:$0xff] }
 0x206   :  { %5972 = vmatpush3.bf16.msra.mxu1 %v6590_v26  ;;  %5108 = vmatprep.mubr.msk.f32.mxu1 %vm6341_vm1, %v6342_v6  ;;  %v3780_v26 = vld [vmem:[%s8185_s4 + $0xb8] sm:$0x3] }
 0x207   :  { %5973 = vmatprep.subr.bf16.mxu1 %v6340_v3 }
 0x209   :  { %5109 = vmatmul.mubr.msk.f32.gmra.mrb[54].mxu1 %vm348_vm6, %v3779_v41  ;;  %v5749_v41 = vpack.c.bf16 %v3679_v24, %v3678_v34  ;;  %v3724_v24 = vld [vmem:[%s8186_s5 + $0x240] sm:$0xff] }
 0x20a   :  { %5975 = vmatpush3.bf16.msra.mxu1 %v6592_v27  ;;  %5111 = vmatprep.mubr.msk.f32.mxu1 %vm6341_vm1, %v6342_v6  ;;  %v3801_v27 = vld [vmem:[%s8185_s4 + $0xc0] sm:$0xff] }
 0x20b   :  { %5976 = vmatprep.subr.bf16.mxu1 %v6340_v3 }
 0x20d   :  { %5112 = vmatmul.mubr.msk.f32.gmra.mrb[56].mxu1 %vm348_vm6, %v3780_v26  ;;  %v3680_v26 = vld [vmem:[%s8186_s5 + $0x150] sm:$0xff] }
 0x20e   :  { %5978 = vmatpush3.bf16.msra.mxu1 %v6594_v28  ;;  %5181 = vmatprep.mubr.msk.f32.mxu1 %vm6341_vm1, %v6342_v6  ;;  %v3802_v28 = vld [vmem:[%s8185_s4 + $0xc8] sm:$0xff]  ;;  %s3614_s4 = sshll.u32 %s6344_s30, 4  ;;  %s3615_s4 = int_to_ptr.vmem [resolvable:$true] %s3614_s4 }
 0x20f   :  { %5979 = vmatprep.subr.bf16.mxu1 %v6340_v3  ;;  %p6321_p1 = scmp.lt.s32.totalorder %s3615_s4, %s3615_s4 }
 0x212   :  { %5981 = vmatpush3.bf16.msra.mxu1 %v6598_v36 }
 0x213   :  { %5982 = vmatprep.subr.bf16.mxu1 %v6340_v3 }
 0x216   :  { %5984 = vmatpush3.bf16.msra.mxu1 %v6600_v38  ;;  %v441_v38 = vld [vmem:[%s8186_s5] sm:$0xff] }
 0x217   :  { %5985 = vmatprep.subr.bf16.mxu1 %v6340_v3 }
 0x21a   :  { %5987 = vmatpush3.bf16.msra.mxu1 %v6603_v42  ;;  %v5695_v42 = vpack.c.bf16 %v442_v39, %v441_v38 }
 0x21b   :  { %5179 = vmatprep.subr.mxu1 %v6342_v6 }
 0x21e   :  { %5180 = vmatpush3.msk.msra.mxu1 %vm243_vm5, %v6614_v43  ;;  %v443_v43 = vld [vmem:[%s8186_s5 + $0x10] sm:$0xff] }
 0x21f   :  { %5182 = vmatmul.mubr.msk.f32.vlgmr.msra.gmra.mrb[58].mxu1 %vm348_vm6, %v3801_v27  ;;  %6012 = vmatprep.subr.bf16.mxu1 %v6340_v3  ;;  %v5698_v49 = vpack.c.bf16 %v444_v44, %v443_v43  ;;  %v3681_v27 = vld [vmem:[%s8186_s5 + $0x158] sm:$0xff]  ;;  %v3693_v43 = vld [vmem:[%s8186_s5 + $0x180] sm:$0xff]  ;;  %v3694_v44 = vld [vmem:[%s8186_s5 + $0x188] sm:$0xff] }
 0x220   :  { %5184 = vmatprep.mubr.msk.f32.mxu1 %vm6341_vm1, %v6342_v6 }
 0x222   :  { %v6948_v29 = vpop.f32.mrb[10].mxu1 }
 0x223   :  { %v4575_v30 = vpop.f32.mrb[11].mxu1  ;;  %5185 = vmatmul.mubr.msk.f32.gmra.mrb[60].mxu1 %vm348_vm6, %v3802_v28  ;;  %v5752_v28 = vpack.c.bf16 %v3681_v27, %v3680_v26 }
 0x224   :  { %5187 = vmatprep.mubr.msk.f32.mxu1 %vm6341_vm1, %v6342_v6  ;;  %v3683_v30 = vld [vmem:[%s8186_s5 + $0x168] sm:$0xff] }
 0x226   :  { %v6956_v32 = vpop.f32.mrb[12].mxu1 }
 0x227   :  { %v4578_v35 = vpop.f32.mrb[13].mxu1  ;;  %5188 = vmatmul.mubr.msk.f32.gmra.mrb[62].mxu1 %vm348_vm6, %v3803_v31 }
 0x228   :  { %5237 = vmatprep.mubr.msk.f32.mxu1 %vm6341_vm1, %v6342_v6 }
 0x22a   :  { %v6961_v36 = vpop.f32.mrb[14].mxu1 }
 0x22b   :  { %v4581_v37 = vpop.f32.mrb[15].mxu1 }
 0x22c   :  { %v3685_v37 = vld [vmem:[%s8186_s5 + $0x178] sm:$0xff] }
 0x23c   :  { %v536_v45 = vpop.f32.mrb[16].mxu1 }
 0x23d   :  { %v4610_v46 = vpop.f32.mrb[17].mxu1  ;;  %4650 = vmatmul.mubr.f32.vlgmr.msra.gmra.mrb[16].mxu0 %v536_v45 }
 0x23e   :  { %5696 = vmatpush3.bf16.msra.mxu0 %v5695_v42  ;;  %4652 = vmatprep.mubr.msk.f32.mxu0 %vm6341_vm1, %v6342_v6 }
 0x23f   :  { %5697 = vmatprep.subr.bf16.mxu0 %v6340_v3 }
 0x240   :  { %v541_v52 = vpop.f32.mrb[18].mxu1 }
 0x241   :  { %v4613_v53 = vpop.f32.mrb[19].mxu1  ;;  %4653 = vmatmul.mubr.f32.gmra.mrb[18].mxu0 %v541_v52  ;;  %v5782_v52 = vpack.c.bf16 %v3696_v51, %v3695_v50  ;;  %v3742_v50 = vld [vmem:[%s8186_s5 + $0x298] sm:$0xff] }
 0x242   :  { %5699 = vmatpush3.bf16.msra.mxu0 %v5698_v49  ;;  %4655 = vmatprep.mubr.msk.f32.mxu0 %vm6341_vm1, %v6342_v6  ;;  %v5779_v49 = vpack.c.bf16 %v3694_v44, %v3693_v43  ;;  %v3697_v53 = vld [vmem:[%s8186_s5 + $0x1a0] sm:$0xff] }
 0x243   :  { %5700 = vmatprep.subr.bf16.mxu0 %v6340_v3  ;;  %v3739_v44 = vld [vmem:[%s8186_s5 + $0x280] sm:$0xff] }
 0x244   :  { %v546_v60 = vpop.f32.mrb[20].mxu1 }
 0x245   :  { %v4616_v61 = vpop.f32.mrb[21].mxu1  ;;  %4656 = vmatmul.mubr.f32.gmra.mrb[20].mxu0 %v546_v60  ;;  %v3700_v60 = vld [vmem:[%s8186_s5 + $0x1b8] sm:$0xff] }
 0x246   :  { %5702 = vmatpush3.bf16.msra.mxu0 %v5701_v55  ;;  %4690 = vmatprep.mubr.msk.f32.mxu0 %vm6341_vm1, %v6342_v6  ;;  %v3698_v55 = vld [vmem:[%s8186_s5 + $0x1a8] sm:$0xff]  ;;  %v5788_v61 = vpack.c.bf16 %v3700_v60, %v3699_v58 }
 0x247   :  { %5703 = vmatprep.subr.bf16.mxu0 %v6340_v3  ;;  %v5785_v57 = vpack.c.bf16 %v3698_v55, %v3697_v53  ;;  %v3743_v53 = vld [vmem:[%s8186_s5 + $0x2a0] sm:$0xff]  ;;  %v3744_v55 = vld [vmem:[%s8186_s5 + $0x2a8] sm:$0xff] }
 0x248   :  { %v5869_v58 = vpack.c.bf16 %v3744_v55, %v3743_v53  ;;  %v3787_v55 = vld [vmem:[%s8186_s5 + $0x390] sm:$0xff] }
 0x24a   :  { %5705 = vmatpush3.bf16.msra.mxu0 %v5704_v62  ;;  %v3701_v62 = vld [vmem:[%s8186_s5 + $0x1c0] sm:$0xff] }
 0x24b   :  { %5706 = vmatprep.subr.bf16.mxu0 %v6340_v3  ;;  %v5791_v1 = vpack.c.bf16 %v3702_v63, %v3701_v62  ;;  %v3746_v62 = vld [vmem:[%s8186_s5 + $0x2b8] sm:$0xff] }
 0x24e   :  { %5708 = vmatpush3.bf16.msra.mxu0 %v5707_v2 }
 0x24f   :  { %5709 = vmatprep.subr.bf16.mxu0 %v6340_v3 }
 0x252   :  { %5711 = vmatpush3.bf16.msra.mxu0 %v5710_v7 }
 0x253   :  { %5712 = vmatprep.subr.bf16.mxu0 %v6340_v3 }
 0x256   :  { %5714 = vmatpush3.bf16.msra.mxu0 %v5713_v10  ;;  %v7023_v48 = vpop.f32.mrb[22].mxu1  ;;  %v3705_v10 = vld [vmem:[%s8186_s5 + $0x1e0] sm:$0xff] }
 0x257   :  { %5715 = vmatprep.subr.bf16.mxu0 %v6340_v3  ;;  %v4727_v33 = vpop.f32.mrb[23].mxu1 }
 0x25a   :  { %5717 = vmatpush3.bf16.msra.mxu0 %v5716_v13  ;;  %v7032_v40 = vpop.f32.mrb[24].mxu1  ;;  %v5797_v13 = vpack.c.bf16 %v3706_v11, %v3705_v10  ;;  %v3750_v10 = vld [vmem:[%s8186_s5 + $0x2d8] sm:$0xff] }
 0x25b   :  { %5736 = vmatprep.subr.bf16.mxu0 %v6340_v3  ;;  %v4730_v16 = vpop.f32.mrb[25].mxu1 }
 0x25c   :  { %v3718_v16 = vld [vmem:[%s8186_s5 + $0x210] sm:$0xff] }
 0x25d   :  { %4691 = vmatmul.mubr.f32.vlgmr.msra.gmra.mrb[16].mxu0 %v6948_v29  ;;  %v3682_v29 = vld [vmem:[%s8186_s5 + $0x160] sm:$0xff] }
 0x25e   :  { %5738 = vmatpush3.bf16.msra.mxu0 %v5737_v14  ;;  %4693 = vmatprep.mubr.msk.f32.mxu0 %vm6341_vm1, %v6342_v6  ;;  %v7044_v17 = vpop.f32.mrb[26].mxu1  ;;  %v5755_v35 = vpack.c.bf16 %v3683_v30, %v3682_v29  ;;  %v5800_v14 = vpack.c.bf16 %v3708_v25, %v3707_v21  ;;  %v3726_v29 = vld [vmem:[%s8186_s5 + $0x250] sm:$0xff]  ;;  %v3727_v30 = vld [vmem:[%s8186_s5 + $0x258] sm:$0xff] }
 0x25f   :  { %5739 = vmatprep.subr.bf16.mxu0 %v6340_v3  ;;  %v4733_v59 = vpop.f32.mrb[27].mxu1  ;;  %v3753_v21 = vld [vmem:[%s8186_s5 + $0x2f0] sm:$0xff]  ;;  %v3754_v25 = vld [vmem:[%s8186_s5 + $0x2f8] sm:$0xff] }
 0x260   :  { %v5827_v59 = vpack.c.bf16 %v3721_v19, %v3720_v18 }
 0x261   :  { %4694 = vmatmul.mubr.f32.gmra.mrb[18].mxu0 %v6956_v32 }
 0x262   :  { %5741 = vmatpush3.bf16.msra.mxu0 %v5740_v54  ;;  %4696 = vmatprep.mubr.msk.f32.mxu0 %vm6341_vm1, %v6342_v6  ;;  %v3719_v54 = vld [vmem:[%s8186_s5 + $0x218] sm:$0xff] }
 0x263   :  { %5742 = vmatprep.subr.bf16.mxu0 %v6340_v3 }
 0x265   :  { %4697 = vmatmul.mubr.f32.gmra.mrb[20].mxu0 %v6961_v36  ;;  %v3684_v36 = vld [vmem:[%s8186_s5 + $0x170] sm:$0xff] }
 0x266   :  { %5744 = vmatpush3.bf16.msra.mxu0 %v5743_v0  ;;  %4766 = vmatprep.mubr.msk.f32.mxu0 %vm6341_vm1, %v6342_v6  ;;  %v5758_v42 = vpack.c.bf16 %v3685_v37, %v3684_v36  ;;  %v3722_v0 = vld [vmem:[%s8186_s5 + $0x230] sm:$0xff]  ;;  %v3728_v36 = vld [vmem:[%s8186_s5 + $0x260] sm:$0xff]  ;;  %v3729_v37 = vld [vmem:[%s8186_s5 + $0x268] sm:$0xff] }
 0x267   :  { %5745 = vmatprep.subr.bf16.mxu0 %v6340_v3  ;;  %v5830_v34 = vpack.c.bf16 %v3723_v20, %v3722_v0  ;;  %v3766_v0 = vld [vmem:[%s8186_s5 + $0x320] sm:$0xff]  ;;  %v3767_v20 = vld [vmem:[%s8186_s5 + $0x328] sm:$0xff] }
 0x26a   :  { %5747 = vmatpush3.bf16.msra.mxu0 %v5746_v23 }
 0x26b   :  { %5748 = vmatprep.subr.bf16.mxu0 %v6340_v3 }
 0x26e   :  { %5750 = vmatpush3.bf16.msra.mxu0 %v5749_v41  ;;  %v3725_v41 = vld [vmem:[%s8186_s5 + $0x248] sm:$0xff] }
 0x26f   :  { %5751 = vmatprep.subr.bf16.mxu0 %v6340_v3 }
 0x270   :  { %v7087_v31 = vpop.f32.mrb[28].mxu1 }
 0x271   :  { %v4803_v32 = vpop.f32.mrb[29].mxu1 }
 0x272   :  { %5753 = vmatpush3.bf16.msra.mxu0 %v5752_v28  ;;  %v5833_v28 = vpack.c.bf16 %v3725_v41, %v3724_v24  ;;  %v3768_v24 = vld [vmem:[%s8186_s5 + $0x330] sm:$0xff]  ;;  %v3769_v41 = vld [vmem:[%s8186_s5 + $0x338] sm:$0xff] }
 0x273   :  { %5754 = vmatprep.subr.bf16.mxu0 %v6340_v3 }
 0x274   :  { %v7096_v38 = vpop.f32.mrb[30].mxu1 }
 0x275   :  { %v4806_v39 = vpop.f32.mrb[31].mxu1 }
 0x276   :  { %5756 = vmatpush3.bf16.msra.mxu0 %v5755_v35  ;;  %v5836_v35 = vpack.c.bf16 %v3727_v30, %v3726_v29  ;;  %v3730_v39 = vld [vmem:[%s8186_s5 + $0x270] sm:$0xff] }
 0x277   :  { %5757 = vmatprep.subr.bf16.mxu0 %v6340_v3  ;;  %v3772_v30 = vld [vmem:[%s8186_s5 + $0x350] sm:$0xff] }
 0x278   :  { %v7105_v45 = vpop.f32.mrb[32].mxu1 }
 0x279   :  { %v4809_v46 = vpop.f32.mrb[33].mxu1 }
 0x27a   :  { %5759 = vmatpush3.bf16.msra.mxu0 %v5758_v42  ;;  %v3731_v42 = vld [vmem:[%s8186_s5 + $0x278] sm:$0xff] }
 0x27b   :  { %5778 = vmatprep.subr.bf16.mxu0 %v6340_v3  ;;  %v5842_v43 = vpack.c.bf16 %v3731_v42, %v3730_v39  ;;  %v3776_v39 = vld [vmem:[%s8186_s5 + $0x370] sm:$0xff]  ;;  %v3777_v42 = vld [vmem:[%s8186_s5 + $0x378] sm:$0xff] }
 0x27d   :  { %4767 = vmatmul.mubr.f32.vlgmr.msra.gmra.mrb[16].mxu0 %v7023_v48 }
 0x27e   :  { %5780 = vmatpush3.bf16.msra.mxu0 %v5779_v49  ;;  %4769 = vmatprep.mubr.msk.f32.mxu0 %vm6341_vm1, %v6342_v6  ;;  %v3741_v49 = vld [vmem:[%s8186_s5 + $0x290] sm:$0xff] }
 0x27f   :  { %5781 = vmatprep.subr.bf16.mxu0 %v6340_v3  ;;  %v5866_v51 = vpack.c.bf16 %v3742_v50, %v3741_v49  ;;  %v3786_v49 = vld [vmem:[%s8186_s5 + $0x388] sm:$0xff] }
 0x281   :  { %4770 = vmatmul.mubr.f32.gmra.mrb[18].mxu0 %v7032_v40  ;;  %v3716_v40 = vld [vmem:[%s8186_s5 + $0x200] sm:$0xff] }
 0x282   :  { %5783 = vmatpush3.bf16.msra.mxu0 %v5782_v52  ;;  %4772 = vmatprep.mubr.msk.f32.mxu0 %vm6341_vm1, %v6342_v6  ;;  %v5821_v47 = vpack.c.bf16 %v3717_v15, %v3716_v40  ;;  %v3763_v40 = vld [vmem:[%s8186_s5 + $0x308] sm:$0xff] }
 0x283   :  { %5784 = vmatprep.subr.bf16.mxu0 %v6340_v3 }
 0x285   :  { %4773 = vmatmul.mubr.f32.gmra.mrb[20].mxu0 %v7044_v17  ;;  %v5824_v17 = vpack.c.bf16 %v3719_v54, %v3718_v16  ;;  %v3764_v54 = vld [vmem:[%s8186_s5 + $0x310] sm:$0xff] }
 0x286   :  { %5786 = vmatpush3.bf16.msra.mxu0 %v5785_v57  ;;  %4842 = vmatprep.mubr.msk.f32.mxu0 %vm6341_vm1, %v6342_v6 }
 0x287   :  { %5787 = vmatprep.subr.bf16.mxu0 %v6340_v3 }
 0x28a   :  { %5789 = vmatpush3.bf16.msra.mxu0 %v5788_v61  ;;  %v7144_v2 = vpop.f32.mrb[34].mxu1  ;;  %v3745_v61 = vld [vmem:[%s8186_s5 + $0x2b0] sm:$0xff] }
 0x28b   :  { %5790 = vmatprep.subr.bf16.mxu0 %v6340_v3  ;;  %v4879_v7 = vpop.f32.mrb[35].mxu1 }
 0x28e   :  { %5792 = vmatpush3.bf16.msra.mxu0 %v5791_v1  ;;  %v7153_v9 = vpop.f32.mrb[36].mxu1  ;;  %v5872_v1 = vpack.c.bf16 %v3746_v62, %v3745_v61  ;;  %v3789_v62 = vld [vmem:[%s8186_s5 + $0x3a0] sm:$0xff] }
 0x28f   :  { %5793 = vmatprep.subr.bf16.mxu0 %v6340_v3  ;;  %v4882_v12 = vpop.f32.mrb[37].mxu1 }
 0x290   :  { %v3751_v12 = vld [vmem:[%s8186_s5 + $0x2e0] sm:$0xff] }
 0x292   :  { %5795 = vmatpush3.bf16.msra.mxu0 %v5794_v8  ;;  %v7162_v48 = vpop.f32.mrb[38].mxu1  ;;  %v5875_v8 = vpack.c.bf16 %v3748_v5, %v3747_v4  ;;  %v3792_v4 = vld [vmem:[%s8186_s5 + $0x3b8] sm:$0xff] }
 0x293   :  { %5796 = vmatprep.subr.bf16.mxu0 %v6340_v3  ;;  %v4885_v33 = vpop.f32.mrb[39].mxu1 }
 0x294   :  { %v5884_v33 = vpack.c.bf16 %v3754_v25, %v3753_v21  ;;  %v3800_v21 = vld [vmem:[%s8186_s5 + $0x3f8] sm:$0xff] }
 0x296   :  { %5798 = vmatpush3.bf16.msra.mxu0 %v5797_v13  ;;  %v3752_v13 = vld [vmem:[%s8186_s5 + $0x2e8] sm:$0xff] }
 0x297   :  { %5799 = vmatprep.subr.bf16.mxu0 %v6340_v3 }
 0x29a   :  { %5801 = vmatpush3.bf16.msra.mxu0 %v5800_v14  ;;  %v3762_v14 = vld [vmem:[%s8186_s5 + $0x300] sm:$0xff] }
 0x29b   :  { %5820 = vmatprep.subr.bf16.mxu0 %v6340_v3  ;;  %v5905_v16 = vpack.c.bf16 %v3763_v40, %v3762_v14  ;;  %v3809_v14 = vld [vmem:[%s8186_s5 + $0x408] sm:$0xff] }
 0x29d   :  { %4843 = vmatmul.mubr.f32.vlgmr.msra.gmra.mrb[16].mxu0 %v7087_v31 }
 0x29e   :  { %5822 = vmatpush3.bf16.msra.mxu0 %v5821_v47  ;;  %4845 = vmatprep.mubr.msk.f32.mxu0 %vm6341_vm1, %v6342_v6 }
 0x29f   :  { %5823 = vmatprep.subr.bf16.mxu0 %v6340_v3 }
 0x2a1   :  { %4846 = vmatmul.mubr.f32.gmra.mrb[18].mxu0 %v7096_v38  ;;  %v5839_v38 = vpack.c.bf16 %v3729_v37, %v3728_v36  ;;  %v3775_v36 = vld [vmem:[%s8186_s5 + $0x368] sm:$0xff] }
 0x2a2   :  { %5825 = vmatpush3.bf16.msra.mxu0 %v5824_v17  ;;  %4848 = vmatprep.mubr.msk.f32.mxu0 %vm6341_vm1, %v6342_v6  ;;  %v3765_v17 = vld [vmem:[%s8186_s5 + $0x318] sm:$0xff] }
 0x2a3   :  { %5826 = vmatprep.subr.bf16.mxu0 %v6340_v3 }
 0x2a4   :  { %v7205_v22 = vpop.f32.mrb[40].mxu1 }
 0x2a5   :  { %4849 = vmatmul.mubr.f32.gmra.mrb[20].mxu0 %v7105_v45  ;;  %v4955_v23 = vpop.f32.mrb[41].mxu1  ;;  %v3740_v45 = vld [vmem:[%s8186_s5 + $0x288] sm:$0xff] }
 0x2a6   :  { %5828 = vmatpush3.bf16.msra.mxu0 %v5827_v59  ;;  %4918 = vmatprep.mubr.msk.f32.mxu0 %vm6341_vm1, %v6342_v6  ;;  %v5863_v46 = vpack.c.bf16 %v3740_v45, %v3739_v44  ;;  %v5908_v59 = vpack.c.bf16 %v3765_v17, %v3764_v54  ;;  %v5926_v44 = vpack.c.bf16 %v3777_v42, %v3776_v39  ;;  %v3812_v17 = vld [vmem:[%s8186_s5 + $0x420] sm:$0xff] }
 0x2a7   :  { %5829 = vmatprep.subr.bf16.mxu0 %v6340_v3 }
 0x2a8   :  { %v7217_v26 = vpop.f32.mrb[42].mxu1 }
 0x2a9   :  { %v4958_v27 = vpop.f32.mrb[43].mxu1 }
 0x2aa   :  { %5831 = vmatpush3.bf16.msra.mxu0 %v5830_v34  ;;  %v5911_v34 = vpack.c.bf16 %v3767_v20, %v3766_v0  ;;  %v3770_v27 = vld [vmem:[%s8186_s5 + $0x340] sm:$0xff]  ;;  %v3815_v0 = vld [vmem:[%s8186_s5 + $0x438] sm:$0xff] }
 0x2ab   :  { %5832 = vmatprep.subr.bf16.mxu0 %v6340_v3 }
 0x2ac   :  { %v7226_v31 = vpop.f32.mrb[44].mxu1 }
 0x2ad   :  { %v4961_v32 = vpop.f32.mrb[45].mxu1 }
 0x2ae   :  { %5834 = vmatpush3.bf16.msra.mxu0 %v5833_v28  ;;  %v3771_v28 = vld [vmem:[%s8186_s5 + $0x348] sm:$0xff] }
 0x2af   :  { %5835 = vmatprep.subr.bf16.mxu0 %v6340_v3  ;;  %v5917_v29 = vpack.c.bf16 %v3771_v28, %v3770_v27  ;;  %v3821_v27 = vld [vmem:[%s8186_s5 + $0x468] sm:$0xff] }
 0x2b2   :  { %5837 = vmatpush3.bf16.msra.mxu0 %v5836_v35  ;;  %v3774_v35 = vld [vmem:[%s8186_s5 + $0x360] sm:$0xff] }
 0x2b3   :  { %5838 = vmatprep.subr.bf16.mxu0 %v6340_v3  ;;  %v5923_v37 = vpack.c.bf16 %v3775_v36, %v3774_v35 }
 0x2b6   :  { %5840 = vmatpush3.bf16.msra.mxu0 %v5839_v38 }
 0x2b7   :  { %5841 = vmatprep.subr.bf16.mxu0 %v6340_v3 }
 0x2ba   :  { %5843 = vmatpush3.bf16.msra.mxu0 %v5842_v43 }
 0x2bb   :  { %5862 = vmatprep.subr.bf16.mxu0 %v6340_v3 }
 0x2bd   :  { %4919 = vmatmul.mubr.f32.vlgmr.msra.gmra.mrb[16].mxu0 %v7144_v2 }
 0x2be   :  { %5864 = vmatpush3.bf16.msra.mxu0 %v5863_v46  ;;  %4921 = vmatprep.mubr.msk.f32.mxu0 %vm6341_vm1, %v6342_v6  ;;  %v7259_v52 = vpop.f32.mrb[46].mxu1  ;;  %v3785_v46 = vld [vmem:[%s8186_s5 + $0x380] sm:$0xff] }
 0x2bf   :  { %5865 = vmatprep.subr.bf16.mxu0 %v6340_v3  ;;  %v5031_v57 = vpop.f32.mrb[47].mxu1 }
 0x2c0   :  { %v3788_v57 = vld [vmem:[%s8186_s5 + $0x398] sm:$0xff] }
 0x2c1   :  { %4922 = vmatmul.mubr.f32.gmra.mrb[18].mxu0 %v7153_v9  ;;  %v3749_v9 = vld [vmem:[%s8186_s5 + $0x2d0] sm:$0xff]  ;;  %v5950_v61 = vpack.c.bf16 %v3788_v57, %v3787_v55 }
 0x2c2   :  { %5867 = vmatpush3.bf16.msra.mxu0 %v5866_v51  ;;  %4924 = vmatprep.mubr.msk.f32.mxu0 %vm6341_vm1, %v6342_v6  ;;  %v7271_v60 = vpop.f32.mrb[48].mxu1  ;;  %v5878_v11 = vpack.c.bf16 %v3750_v10, %v3749_v9  ;;  %v5947_v51 = vpack.c.bf16 %v3786_v49, %v3785_v46  ;;  %v3796_v9 = vld [vmem:[%s8186_s5 + $0x3d8] sm:$0xff] }
 0x2c3   :  { %5868 = vmatprep.subr.bf16.mxu0 %v6340_v3  ;;  %v5034_v63 = vpop.f32.mrb[49].mxu1 }
 0x2c4   :  { %v3790_v63 = vld [vmem:[%s8186_s5 + $0x3a8] sm:$0xff] }
 0x2c5   :  { %4925 = vmatmul.mubr.f32.gmra.mrb[20].mxu0 %v7162_v48  ;;  %v5881_v48 = vpack.c.bf16 %v3752_v13, %v3751_v12  ;;  %v3798_v12 = vld [vmem:[%s8186_s5 + $0x3e8] sm:$0xff] }
 0x2c6   :  { %5870 = vmatpush3.bf16.msra.mxu0 %v5869_v58  ;;  %4994 = vmatprep.mubr.msk.f32.mxu0 %vm6341_vm1, %v6342_v6  ;;  %v7283_v2 = vpop.f32.mrb[50].mxu1 }
 0x2c7   :  { %5871 = vmatprep.subr.bf16.mxu0 %v6340_v3  ;;  %v5037_v7 = vpop.f32.mrb[51].mxu1 }
 0x2c8   :  { %v3794_v7 = vld [vmem:[%s8186_s5 + $0x3c8] sm:$0xff] }
 0x2ca   :  { %5873 = vmatpush3.bf16.msra.mxu0 %v5872_v1  ;;  %v5953_v1 = vpack.c.bf16 %v3790_v63, %v3789_v62 }
 0x2cb   :  { %5874 = vmatprep.subr.bf16.mxu0 %v6340_v3 }
 0x2ce   :  { %5876 = vmatpush3.bf16.msra.mxu0 %v5875_v8 }
 0x2cf   :  { %5877 = vmatprep.subr.bf16.mxu0 %v6340_v3 }
 0x2d2   :  { %5879 = vmatpush3.bf16.msra.mxu0 %v5878_v11  ;;  %v3797_v11 = vld [vmem:[%s8186_s5 + $0x3e0] sm:$0xff] }
 0x2d3   :  { %5880 = vmatprep.subr.bf16.mxu0 %v6340_v3  ;;  %v5965_v13 = vpack.c.bf16 %v3798_v12, %v3797_v11 }
 0x2d6   :  { %5882 = vmatpush3.bf16.msra.mxu0 %v5881_v48  ;;  %v3799_v48 = vld [vmem:[%s8186_s5 + $0x3f0] sm:$0xff] }
 0x2d7   :  { %5883 = vmatprep.subr.bf16.mxu0 %v6340_v3  ;;  %v5968_v25 = vpack.c.bf16 %v3800_v21, %v3799_v48 }
 0x2d8   :  { %v7320_v15 = vpop.f32.mrb[52].mxu1 }
 0x2d9   :  { %v5107_v47 = vpop.f32.mrb[53].mxu1 }
 0x2da   :  { %5885 = vmatpush3.bf16.msra.mxu0 %v5884_v33  ;;  %v3808_v33 = vld [vmem:[%s8186_s5 + $0x400] sm:$0xff]  ;;  %v3810_v47 = vld [vmem:[%s8186_s5 + $0x410] sm:$0xff] }
 0x2db   :  { %5904 = vmatprep.subr.bf16.mxu0 %v6340_v3  ;;  %v5989_v40 = vpack.c.bf16 %v3809_v14, %v3808_v33 }
 0x2dc   :  { %v7329_v18 = vpop.f32.mrb[54].mxu1 }
 0x2dd   :  { %4995 = vmatmul.mubr.f32.vlgmr.msra.gmra.mrb[16].mxu0 %v7205_v22  ;;  %v5110_v19 = vpop.f32.mrb[55].mxu1 }
 0x2de   :  { %5906 = vmatpush3.bf16.msra.mxu0 %v5905_v16  ;;  %4997 = vmatprep.mubr.msk.f32.mxu0 %vm6341_vm1, %v6342_v6  ;;  %v3811_v16 = vld [vmem:[%s8186_s5 + $0x418] sm:$0xff]  ;;  %v3813_v19 = vld [vmem:[%s8186_s5 + $0x428] sm:$0xff] }
 0x2df   :  { %5907 = vmatprep.subr.bf16.mxu0 %v6340_v3  ;;  %v5992_v54 = vpack.c.bf16 %v3811_v16, %v3810_v47 }
 0x2e0   :  { %v7341_v23 = vpop.f32.mrb[56].mxu1 }
 0x2e1   :  { %4998 = vmatmul.mubr.f32.gmra.mrb[18].mxu0 %v7217_v26  ;;  %v5113_v22 = vpop.f32.mrb[57].mxu1  ;;  %v5914_v26 = vpack.c.bf16 %v3769_v41, %v3768_v24  ;;  %v3819_v24 = vld [vmem:[%s8186_s5 + $0x458] sm:$0xff] }
 0x2e2   :  { %5909 = vmatpush3.bf16.msra.mxu0 %v5908_v59  ;;  %5000 = vmatprep.mubr.msk.f32.mxu0 %vm6341_vm1, %v6342_v6  ;;  %v5995_v59 = vpack.c.bf16 %v3813_v19, %v3812_v17  ;;  %v3817_v22 = vld [vmem:[%s8186_s5 + $0x448] sm:$0xff] }
 0x2e3   :  { %5910 = vmatprep.subr.bf16.mxu0 %v6340_v3 }
 0x2e5   :  { %5001 = vmatmul.mubr.f32.gmra.mrb[20].mxu0 %v7226_v31  ;;  %v3773_v31 = vld [vmem:[%s8186_s5 + $0x358] sm:$0xff] }
 0x2e6   :  { %5912 = vmatpush3.bf16.msra.mxu0 %v5911_v34  ;;  %5070 = vmatprep.mubr.msk.f32.mxu0 %vm6341_vm1, %v6342_v6  ;;  %v5920_v32 = vpack.c.bf16 %v3773_v31, %v3772_v30  ;;  %v3823_v30 = vld [vmem:[%s8186_s5 + $0x478] sm:$0xff] }
 0x2e7   :  { %5913 = vmatprep.subr.bf16.mxu0 %v6340_v3 }
 0x2ea   :  { %5915 = vmatpush3.bf16.msra.mxu0 %v5914_v26  ;;  %v3820_v26 = vld [vmem:[%s8186_s5 + $0x460] sm:$0xff] }
 0x2eb   :  { %5916 = vmatprep.subr.bf16.mxu0 %v6340_v3  ;;  %v6007_v28 = vpack.c.bf16 %v3821_v27, %v3820_v26  ;;  %v3831_v26 = vld [vmem:[%s8190_s9 + $0x90] sm:$0xff]  ;;  %v3832_v27 = vld [vmem:[%s8190_s9 + $0x98] sm:$0xff] }
 0x2ee   :  { %5918 = vmatpush3.bf16.msra.mxu0 %v5917_v29  ;;  %v3822_v29 = vld [vmem:[%s8186_s5 + $0x470] sm:$0xff] }
 0x2ef   :  { %5919 = vmatprep.subr.bf16.mxu0 %v6340_v3  ;;  %v6010_v31 = vpack.c.bf16 %v3823_v30, %v3822_v29  ;;  %v3833_v29 = vld [vmem:[%s8190_s9 + $0xa0] sm:$0xff]  ;;  %v3834_v30 = vld [vmem:[%s8190_s9 + $0xa8] sm:$0xff] }
 0x2f2   :  { %5921 = vmatpush3.bf16.msra.mxu0 %v5920_v32  ;;  %v7377_v38 = vpop.f32.mrb[58].mxu1 }
 0x2f3   :  { %5922 = vmatprep.subr.bf16.mxu0 %v6340_v3  ;;  %v5183_v43 = vpop.f32.mrb[59].mxu1 }
 0x2f6   :  { %5924 = vmatpush3.bf16.msra.mxu0 %v5923_v37  ;;  %v7386_v45 = vpop.f32.mrb[60].mxu1 }
 0x2f7   :  { %5925 = vmatprep.subr.bf16.mxu0 %v6340_v3  ;;  %v5186_v50 = vpop.f32.mrb[61].mxu1 }
 0x2fa   :  { %5927 = vmatpush3.bf16.msra.mxu0 %v5926_v44  ;;  %v7395_v53 = vpop.f32.mrb[62].mxu1 }
 0x2fb   :  { %5946 = vmatprep.subr.bf16.mxu0 %v6340_v3  ;;  %v5189_v58 = vpop.f32.mrb[63].mxu1 }
 0x2fd   :  { %5071 = vmatmul.mubr.f32.vlgmr.msra.gmra.mrb[16].mxu0 %v7259_v52  ;;  %v3791_v52 = vld [vmem:[%s8186_s5 + $0x3b0] sm:$0xff] }
 0x2fe   :  { %5948 = vmatpush3.bf16.msra.mxu0 %v5947_v51  ;;  %5073 = vmatprep.mubr.msk.f32.mxu0 %vm6341_vm1, %v6342_v6  ;;  %v5956_v5 = vpack.c.bf16 %v3792_v4, %v3791_v52 }
 0x2ff   :  { %5949 = vmatprep.subr.bf16.mxu0 %v6340_v3 }
 0x301   :  { %5074 = vmatmul.mubr.f32.gmra.mrb[18].mxu0 %v7271_v60  ;;  %v3793_v60 = vld [vmem:[%s8186_s5 + $0x3c0] sm:$0xff] }
 0x302   :  { %5951 = vmatpush3.bf16.msra.mxu0 %v5950_v61  ;;  %5076 = vmatprep.mubr.msk.f32.mxu0 %vm6341_vm1, %v6342_v6  ;;  %v5959_v8 = vpack.c.bf16 %v3794_v7, %v3793_v60 }
 0x303   :  { %5952 = vmatprep.subr.bf16.mxu0 %v6340_v3 }
 0x305   :  { %5077 = vmatmul.mubr.f32.gmra.mrb[20].mxu0 %v7283_v2  ;;  %v3795_v2 = vld [vmem:[%s8186_s5 + $0x3d0] sm:$0xff] }
 0x306   :  { %5954 = vmatpush3.bf16.msra.mxu0 %v5953_v1  ;;  %5146 = vmatprep.mubr.msk.f32.mxu0 %vm6341_vm1, %v6342_v6  ;;  %v5962_v10 = vpack.c.bf16 %v3796_v9, %v3795_v2 }
 0x307   :  { %5955 = vmatprep.subr.bf16.mxu0 %v6340_v3 }
 0x30a   :  { %5957 = vmatpush3.bf16.msra.mxu0 %v5956_v5 }
 0x30b   :  { %5958 = vmatprep.subr.bf16.mxu0 %v6340_v3 }
 0x30e   :  { %5960 = vmatpush3.bf16.msra.mxu0 %v5959_v8 }
 0x30f   :  { %5961 = vmatprep.subr.bf16.mxu0 %v6340_v3 }
 0x312   :  { %5963 = vmatpush3.bf16.msra.mxu0 %v5962_v10 }
 0x313   :  { %5964 = vmatprep.subr.bf16.mxu0 %v6340_v3 }
 0x316   :  { %5966 = vmatpush3.bf16.msra.mxu0 %v5965_v13  ;;  %v2078_v13 = vld [vmem:[%s8187_s6] sm:$0x1] }
 0x317   :  { %5967 = vmatprep.subr.bf16.mxu0 %v6340_v3 }
 0x31a   :  { %5969 = vmatpush3.bf16.msra.mxu0 %v5968_v25  ;;  %v2079_v25 = vld [vmem:[%s8188_s7] sm:$0x1] }
 0x31b   :  { %5988 = vmatprep.subr.bf16.mxu0 %v6340_v3 }
 0x31d   :  { %5147 = vmatmul.mubr.f32.vlgmr.msra.gmra.mrb[16].mxu0 %v7320_v15  ;;  %v3814_v15 = vld [vmem:[%s8186_s5 + $0x430] sm:$0xff] }
 0x31e   :  { %5990 = vmatpush3.bf16.msra.mxu0 %v5989_v40  ;;  %5149 = vmatprep.mubr.msk.f32.mxu0 %vm6341_vm1, %v6342_v6  ;;  %v5998_v20 = vpack.c.bf16 %v3815_v0, %v3814_v15 }
 0x31f   :  { %5991 = vmatprep.subr.bf16.mxu0 %v6340_v3 }
 0x321   :  { %5150 = vmatmul.mubr.f32.gmra.mrb[18].mxu0 %v7329_v18  ;;  %v3816_v18 = vld [vmem:[%s8186_s5 + $0x440] sm:$0xff] }
 0x322   :  { %5993 = vmatpush3.bf16.msra.mxu0 %v5992_v54  ;;  %5152 = vmatprep.mubr.msk.f32.mxu0 %vm6341_vm1, %v6342_v6  ;;  %v6001_v34 = vpack.c.bf16 %v3817_v22, %v3816_v18 }
 0x323   :  { %5994 = vmatprep.subr.bf16.mxu0 %v6340_v3 }
 0x325   :  { %5153 = vmatmul.mubr.f32.gmra.mrb[20].mxu0 %v7341_v23  ;;  %v3818_v23 = vld [vmem:[%s8186_s5 + $0x450] sm:$0xff] }
 0x326   :  { %5996 = vmatpush3.bf16.msra.mxu0 %v5995_v59  ;;  %5222 = vmatprep.mubr.msk.f32.mxu0 %vm6341_vm1, %v6342_v6  ;;  %v6004_v41 = vpack.c.bf16 %v3819_v24, %v3818_v23  ;;  %v3830_v23 = vld [vmem:[%s8190_s9 + $0x88] sm:$0xff]  ;;  %v3826_v24 = vld [vmem:[%s8189_s8 + $0x2] sm:$0x3] }
 0x327   :  { %5997 = vmatprep.subr.bf16.mxu0 %v6340_v3 }
 0x32a   :  { %5999 = vmatpush3.bf16.msra.mxu0 %v5998_v20 }
 0x32b   :  { %6000 = vmatprep.subr.bf16.mxu0 %v6340_v3 }
 0x32e   :  { %6002 = vmatpush3.bf16.msra.mxu0 %v6001_v34  ;;  %v2132_v34 = vld [vmem:[%s8189_s8] sm:$0x3] }
 0x32f   :  { %6003 = vmatprep.subr.bf16.mxu0 %v6340_v3 }
 0x332   :  { %6005 = vmatpush3.bf16.msra.mxu0 %v6004_v41 }
 0x333   :  { %6006 = vmatprep.subr.bf16.mxu0 %v6340_v3 }
 0x336   :  { %6008 = vmatpush3.bf16.msra.mxu0 %v6007_v28  ;;  %v6022_v28 = vpack.c.bf16 %v3832_v27, %v3831_v26  ;;  %v3870_v27 = vld [vmem:[%s8190_s9 + $0x198] sm:$0xff] }
 0x337   :  { %6009 = vmatprep.subr.bf16.mxu0 %v6340_v3 }
 0x33a   :  { %6011 = vmatpush3.bf16.msra.mxu0 %v6010_v31  ;;  %v6025_v31 = vpack.c.bf16 %v3834_v30, %v3833_v29  ;;  %v3853_v29 = vld [vmem:[%s8190_s9 + $0x128] sm:$0xff] }
 0x33b   :  { %6069 = vmatprep.subr.bf16.mxu0 %v6340_v3 }
 0x33d   :  { %5223 = vmatmul.mubr.f32.vlgmr.msra.gmra.mrb[16].mxu0 %v7377_v38 }
 0x33e   :  { %5225 = vmatprep.mubr.msk.f32.mxu0 %vm6341_vm1, %v6342_v6 }
 0x341   :  { %5226 = vmatmul.mubr.f32.gmra.mrb[18].mxu0 %v7386_v45 }
 0x342   :  { %5228 = vmatprep.mubr.msk.f32.mxu0 %vm6341_vm1, %v6342_v6 }
 0x345   :  { %5229 = vmatmul.mubr.f32.gmra.mrb[20].mxu0 %v7395_v53 }
 0x346   :  { %5360 = vmatprep.mubr.msk.f32.mxu0 %vm6341_vm1, %v6342_v6 }
 0x410   :  { %v2061_v32 = vpop.f32.mrb[16].mxu0 }
 0x411   :  { %v5224_v35 = vpop.f32.mrb[17].mxu0  ;;  %v2089_v37 = vmul.f32 %v2061_v32, %v2061_v32 }
 0x412   :  { %v3836_v35 = vld [vmem:[%s8190_s9 + $0xb8] sm:$0xff] }
 0x414   :  { %v2066_v36 = vpop.f32.mrb[18].mxu0 }
 0x415   :  { %v2080_v39 = vadd.f32 %v2066_v36, %v2061_v32  ;;  %v2090_v42 = vmul.f32 %v2066_v36, %v2066_v36  ;;  %v5227_v38 = vpop.f32.mrb[19].mxu0 }
 0x416   :  { %v3839_v38 = vld [vmem:[%s8190_s9 + $0xd0] sm:$0xff] }
 0x417   :  { %v2092_v43 = vadd.f32 %v2090_v42, %v2089_v37  ;;  %v3837_v37 = vld [vmem:[%s8190_s9 + $0xc0] sm:$0xff] }
 0x418   :  { %v2071_v44 = vpop.f32.mrb[20].mxu0 }
 0x419   :  { %v2081_v46 = vsel %vm243_vm5, %v2071_v44, 0.0  ;;  %v2091_v45 = vmul.f32 %v2071_v44, %v2071_v44  ;;  %v5230_v49 = vpop.f32.mrb[21].mxu0 }
 0x41a   :  { %v2082_v50 = vadd.f32 %v2081_v46, %v2080_v39  ;;  %v3838_v39 = vld [vmem:[%s8190_s9 + $0xc8] sm:$0xff]  ;;  %v3841_v46 = vld [vmem:[%s8190_s9 + $0xe0] sm:$0xff] }
 0x41b   :  { %v2093_v51 = vsel %vm243_vm5, %v2091_v45, 0.0  ;;  %v6031_v42 = vpack.c.bf16 %v3838_v39, %v3837_v37  ;;  %v3842_v45 = vld [vmem:[%s8190_s9 + $0xe8] sm:$0xff]  ;;  %v3855_v37 = vld [vmem:[%s8190_s9 + $0x138] sm:$0xff] }
 0x41c   :  { %v2083_v53 = vrot.slane %v2082_v50, 4  ;;  %v2094_v55 = vadd.f32 %v2093_v51, %v2092_v43  ;;  %v3840_v43 = vld [vmem:[%s8190_s9 + $0xd8] sm:$0xff]  ;;  %v6037_v49 = vpack.c.bf16 %v3842_v45, %v3841_v46  ;;  %v3857_v46 = vld [vmem:[%s8190_s9 + $0x148] sm:$0xff] }
 0x41d   :  { %v3844_v51 = vld [vmem:[%s8190_s9 + $0xf8] sm:$0xff] }
 0x41e   :  { %v2084_v57 = vadd.f32 %v2083_v53, %v2082_v50  ;;  %v2095_v58 = vrot.slane %v2094_v55, 4  ;;  %v3843_v50 = vld [vmem:[%s8190_s9 + $0xf0] sm:$0xff] }
 0x41f   :  { %v6040_v53 = vpack.c.bf16 %v3844_v51, %v3843_v50  ;;  %v3876_v50 = vld [vmem:[%s8190_s9 + $0x1c8] sm:$0xff] }
 0x420   :  { %v2085_v61 = vrot.slane %v2084_v57, 2  ;;  %v2096_v62 = vadd.f32 %v2095_v58, %v2094_v55  ;;  %v2210_v58 = vld [vmem:[%s8190_s9] sm:$0xff] }
 0x422   :  { %v2086_v63 = vadd.f32 %v2085_v61, %v2084_v57  ;;  %v2097_v1 = vrot.slane %v2096_v62, 2  ;;  %v2211_v61 = vld [vmem:[%s8190_s9 + $0x8] sm:$0xff] }
 0x424   :  { %v2087_v52 = vrot.slane %v2086_v63, 1  ;;  %v2098_v4 = vadd.f32 %v2097_v1, %v2096_v62  ;;  %v6043_v62 = vpack.c.bf16 %v2211_v61, %v2210_v58  ;;  %v2213_v1 = vld [vmem:[%s8190_s9 + $0x18] sm:$0xff]  ;;  %v3860_v61 = vld [vmem:[%s8190_s9 + $0x160] sm:$0xff] }
 0x426   :  { %v2088_v5 = vadd.f32 %v2087_v52, %v2086_v63  ;;  %v2099_v60 = vrot.slane %v2098_v4, 1  ;;  %v2212_v63 = vld [vmem:[%s8190_s9 + $0x10] sm:$0xff] }
 0x428   :  { %v2100_v7 = vadd.f32 %v2099_v60, %v2098_v4  ;;  %v2101_v8 = vmul.f32 0.055555556, %v2088_v5  ;;  %v6046_v5 = vpack.c.bf16 %v2213_v1, %v2212_v63  ;;  %v2214_v60 = vld [vmem:[%s8190_s9 + $0x20] sm:$0xff]  ;;  %v3877_v1 = vld [vmem:[%s8190_s9 + $0x1d0] sm:$0xff] }
 0x42a   :  { %v2102_v2 = vmul.f32 0.055555556, %v2100_v7  ;;  %v2103_v9 = vmul.f32 %v2101_v8, %v2101_v8  ;;  %v2215_v7 = vld [vmem:[%s8190_s9 + $0x28] sm:$0xff] }
 0x42c   :  { %v2104_v10 = vsub.f32 %v2102_v2, %v2103_v9  ;;  %v2216_v2 = vld [vmem:[%s8190_s9 + $0x30] sm:$0xff]  ;;  %v2217_v9 = vld [vmem:[%s8190_s9 + $0x38] sm:$0xff] }
 0x42e   :  { %v2105_v11 = vmax.f32 %v2104_v10, 0.0  ;;  %v6052_v10 = vpack.c.bf16 %v2217_v9, %v2216_v2 }
 0x430   :  { %v2106_v12 = vadd.f32 1e-05, %v2105_v11  ;;  %v2218_v11 = vld [vmem:[%s8190_s9 + $0x40] sm:$0xff] }
 0x432   :  { %6314 = vrsqrt.f32 %v2106_v12  ;;  %v2219_v12 = vld [vmem:[%s8190_s9 + $0x48] sm:$0xff] }
 0x43c   :  { %v6315_v48 = vpop.eup %6314 }
 0x43d   :  { %v2108_v21 = vmul.f32 %v6315_v48, %v2078_v13  ;;  %v6055_v13 = vpack.c.bf16 %v2219_v12, %v2218_v11  ;;  %v2220_v48 = vld [vmem:[%s8190_s9 + $0x50] sm:$0xff]  ;;  %v3882_v11 = vld [vmem:[%s8190_s9 + $0x1f8] sm:$0xff] }
 0x43f   :  { %v2109_v33 = vmul.f32 %v2108_v21, %v2101_v8  ;;  %v2115_v14 = vrot.slane %v2108_v21, %v6571_v56  ;;  %v6049_v8 = vpack.c.bf16 %v2215_v7, %v2214_v60  ;;  %v2221_v21 = vld [vmem:[%s8190_s9 + $0x58] sm:$0xff]  ;;  %v3879_v7 = vld [vmem:[%s8190_s9 + $0x1e0] sm:$0xff] }
 0x440   :  { %v3863_v60 = vld [vmem:[%s8190_s9 + $0x178] sm:$0xff] }
 0x441   :  { %v2110_v40 = vsub.f32 %v2079_v25, %v2109_v33  ;;  %v2117_v47 = vmul.f32 %v2115_v14, %v2061_v32  ;;  %v2118_v16 = vmul.f32 %v2115_v14, %v2066_v36  ;;  %v2119_v54 = vmul.f32 %v2115_v14, %v2071_v44  ;;  %v3835_v32 = vld [vmem:[%s8190_s9 + $0xb0] sm:$0xff]  ;;  %v2222_v33 = vld [vmem:[%s8190_s9 + $0x60] sm:$0xff]  ;;  %v2223_v14 = vld [vmem:[%s8190_s9 + $0x68] sm:$0xff] }
 0x442   :  { %v6028_v36 = vpack.c.bf16 %v3836_v35, %v3835_v32  ;;  %v6034_v44 = vpack.c.bf16 %v3840_v43, %v3839_v38  ;;  %v6058_v25 = vpack.c.bf16 %v2221_v21, %v2220_v48  ;;  %v3872_v32 = vld [vmem:[%s8190_s9 + $0x1a8] sm:$0xff]  ;;  %v3874_v38 = vld [vmem:[%s8190_s9 + $0x1b8] sm:$0xff] }
 0x443   :  { %v2124_v17 = vrot.slane %v2110_v40, %v6571_v56  ;;  %v3829_v56 = vld [vmem:[%s8190_s9 + $0x80] sm:$0xff]  ;;  %v6061_v40 = vpack.c.bf16 %v2223_v14, %v2222_v33 }
 0x444   :  { %v6019_v41 = vpack.c.bf16 %v3830_v23, %v3829_v56  ;;  %v3867_v56 = vld [vmem:[%s8190_s9 + $0x180] sm:$0xff]  ;;  %v3868_v23 = vld [vmem:[%s8190_s9 + $0x188] sm:$0xff] }
 0x445   :  { %v2126_v19 = vadd.f32 %v2124_v17, %v2117_v47  ;;  %v2127_v59 = vadd.f32 %v2124_v17, %v2118_v16  ;;  %v2128_v15 = vadd.f32 %v2124_v17, %v2119_v54  ;;  %v2224_v47 = vld [vmem:[%s8190_s9 + $0x70] sm:$0xff]  ;;  %v2225_v16 = vld [vmem:[%s8190_s9 + $0x78] sm:$0xff]  ;;  %v3845_v17 = vld [vmem:[%s8189_s8 + $0x4] sm:$0x3] }
 0x446   :  { %v6064_v54 = vpack.c.bf16 %v2225_v16, %v2224_v47  ;;  %v3886_v47 = vld [vmem:[%s8190_s9 + $0x200] sm:$0xff]  ;;  %v3887_v16 = vld [vmem:[%s8190_s9 + $0x208] sm:$0xff] }
 0x447   :  { %v2129_v0 = vmax.f32 %v2126_v19, 0.0  ;;  %v2130_v20 = vmax.f32 %v2127_v59, 0.0  ;;  %v7545_v22 = vmax.f32 %v2128_v15, 0.0  ;;  %v3864_v19 = vld [vmem:[%s8189_s8 + $0x6] sm:$0x3]  ;;  %v3849_v15 = vld [vmem:[%s8190_s9 + $0x108] sm:$0xff] }
 0x448   :  { %v3848_v59 = vld [vmem:[%s8190_s9 + $0x100] sm:$0xff] }
 0x449   :  { %v7541_v18 = vpack.c.bf16 %v2130_v20, %v2129_v0  ;;  %v3850_v0 = vld [vmem:[%s8190_s9 + $0x110] sm:$0xff]  ;;  %v6070_v20 = vpack.c.bf16 %v3849_v15, %v3848_v59  ;;  %v3889_v15 = vld [vmem:[%s8190_s9 + $0x218] sm:$0xff] }
 0x44a   :  { %v3888_v59 = vld [vmem:[%s8190_s9 + $0x210] sm:$0xff] }
 0x44b   :  { %6014 = vmatpush3.bf16.msra.mxu1 %v7541_v18  ;;  %6071 = vmatpush3.bf16.msra.mxu0 %v6070_v20  ;;  %v3906_v20 = vld [vmem:[%s8190_s9 + $0x288] sm:$0xff] }
 0x44c   :  { %5235 = vmatprep.subr.mxu1 %v6342_v6  ;;  %6072 = vmatprep.subr.bf16.mxu0 %v6340_v3 }
 0x44f   :  { %5236 = vmatpush3.msk.msra.mxu1 %vm243_vm5, %v7545_v22 }
 0x450   :  { %6015 = vmatprep.subr.bf16.mxu1 %v6340_v3  ;;  %5238 = vmatmul.mubr.msk.f32.vlgmr.msra.gmra.mrb[64].mxu1 %vm2133_vm7, %v2132_v34  ;;  %v3851_v34 = vld [vmem:[%s8190_s9 + $0x118] sm:$0xff] }
 0x451   :  { %6017 = vmatpush3.bf16.msra.mxu1 %v7541_v18  ;;  %5246 = vmatprep.mubr.msk.f32.mxu1 %vm6341_vm1, %v6342_v6  ;;  %v6073_v26 = vpack.c.bf16 %v3851_v34, %v3850_v0  ;;  %v3905_v0 = vld [vmem:[%s8190_s9 + $0x280] sm:$0xff] }
 0x452   :  { %5244 = vmatprep.subr.mxu1 %v6342_v6 }
 0x453   :  { %6074 = vmatpush3.bf16.msra.mxu0 %v6073_v26  ;;  %v3891_v26 = vld [vmem:[%s8190_s9 + $0x228] sm:$0xff] }
 0x454   :  { %6075 = vmatprep.subr.bf16.mxu0 %v6340_v3 }
 0x455   :  { %5245 = vmatpush3.msk.msra.mxu1 %vm243_vm5, %v7545_v22 }
 0x456   :  { %5247 = vmatmul.mubr.msk.f32.vlgmr.msra.gmra.mrb[66].mxu1 %vm2133_vm7, %v3826_v24  ;;  %6018 = vmatprep.subr.bf16.mxu1 %v6340_v3  ;;  %v6097_v24 = vpack.c.bf16 %v3868_v23, %v3867_v56  ;;  %v3902_v56 = vld [vmem:[%s8189_s8 + $0xa] sm:$0x3]  ;;  %v6127_v23 = vpack.c.bf16 %v3889_v15, %v3888_v59  ;;  %v3926_v59 = vld [vmem:[%s8190_s9 + $0x310] sm:$0xff]  ;;  %v3927_v15 = vld [vmem:[%s8190_s9 + $0x318] sm:$0xff] }
 0x457   :  { %6020 = vmatpush3.bf16.msra.mxu1 %v6019_v41  ;;  %5281 = vmatprep.mubr.msk.f32.mxu1 %vm6341_vm1, %v6342_v6  ;;  %v3869_v41 = vld [vmem:[%s8190_s9 + $0x190] sm:$0xff] }
 0x458   :  { %6021 = vmatprep.subr.bf16.mxu1 %v6340_v3  ;;  %v6100_v30 = vpack.c.bf16 %v3870_v27, %v3869_v41  ;;  %v3890_v41 = vld [vmem:[%s8190_s9 + $0x220] sm:$0xff]  ;;  %v3907_v27 = vld [vmem:[%s8190_s9 + $0x290] sm:$0xff] }
 0x45b   :  { %6023 = vmatpush3.bf16.msra.mxu1 %v6022_v28  ;;  %v3852_v28 = vld [vmem:[%s8190_s9 + $0x120] sm:$0xff] }
 0x45c   :  { %6024 = vmatprep.subr.bf16.mxu1 %v6340_v3  ;;  %v6076_v35 = vpack.c.bf16 %v3853_v29, %v3852_v28  ;;  %v3908_v28 = vld [vmem:[%s8190_s9 + $0x298] sm:$0xff]  ;;  %v6130_v29 = vpack.c.bf16 %v3891_v26, %v3890_v41  ;;  %v3928_v41 = vld [vmem:[%s8190_s9 + $0x320] sm:$0xff]  ;;  %v3929_v26 = vld [vmem:[%s8190_s9 + $0x328] sm:$0xff] }
 0x45e   :  { %6077 = vmatpush3.bf16.msra.mxu0 %v6076_v35  ;;  %v3909_v35 = vld [vmem:[%s8190_s9 + $0x2a0] sm:$0xff] }
 0x45f   :  { %6026 = vmatpush3.bf16.msra.mxu1 %v6025_v31  ;;  %v3871_v31 = vld [vmem:[%s8190_s9 + $0x1a0] sm:$0xff]  ;;  %6078 = vmatprep.subr.bf16.mxu0 %v6340_v3 }
 0x460   :  { %6027 = vmatprep.subr.bf16.mxu1 %v6340_v3  ;;  %v6103_v39 = vpack.c.bf16 %v3872_v32, %v3871_v31  ;;  %v3892_v31 = vld [vmem:[%s8190_s9 + $0x230] sm:$0xff]  ;;  %v3893_v32 = vld [vmem:[%s8190_s9 + $0x238] sm:$0xff] }
 0x463   :  { %6029 = vmatpush3.bf16.msra.mxu1 %v6028_v36  ;;  %v3854_v36 = vld [vmem:[%s8190_s9 + $0x130] sm:$0xff] }
 0x464   :  { %6030 = vmatprep.subr.bf16.mxu1 %v6340_v3  ;;  %v6079_v43 = vpack.c.bf16 %v3855_v37, %v3854_v36  ;;  %v3910_v36 = vld [vmem:[%s8190_s9 + $0x2a8] sm:$0xff]  ;;  %v6133_v37 = vpack.c.bf16 %v3893_v32, %v3892_v31  ;;  %v3930_v31 = vld [vmem:[%s8190_s9 + $0x330] sm:$0xff]  ;;  %v3931_v32 = vld [vmem:[%s8190_s9 + $0x338] sm:$0xff] }
 0x466   :  { %6080 = vmatpush3.bf16.msra.mxu0 %v6079_v43  ;;  %v3911_v43 = vld [vmem:[%s8190_s9 + $0x2b0] sm:$0xff] }
 0x467   :  { %6032 = vmatpush3.bf16.msra.mxu1 %v6031_v42  ;;  %v3873_v42 = vld [vmem:[%s8190_s9 + $0x1b0] sm:$0xff]  ;;  %6081 = vmatprep.subr.bf16.mxu0 %v6340_v3 }
 0x468   :  { %6033 = vmatprep.subr.bf16.mxu1 %v6340_v3  ;;  %v6106_v45 = vpack.c.bf16 %v3874_v38, %v3873_v42  ;;  %v3894_v42 = vld [vmem:[%s8190_s9 + $0x240] sm:$0xff]  ;;  %v3895_v38 = vld [vmem:[%s8190_s9 + $0x248] sm:$0xff] }
 0x46b   :  { %6035 = vmatpush3.bf16.msra.mxu1 %v6034_v44  ;;  %v3856_v44 = vld [vmem:[%s8190_s9 + $0x140] sm:$0xff] }
 0x46c   :  { %6036 = vmatprep.subr.bf16.mxu1 %v6340_v3  ;;  %v6082_v51 = vpack.c.bf16 %v3857_v46, %v3856_v44  ;;  %v3912_v44 = vld [vmem:[%s8190_s9 + $0x2b8] sm:$0xff]  ;;  %v6136_v46 = vpack.c.bf16 %v3895_v38, %v3894_v42  ;;  %v3932_v42 = vld [vmem:[%s8190_s9 + $0x340] sm:$0xff]  ;;  %v3933_v38 = vld [vmem:[%s8190_s9 + $0x348] sm:$0xff] }
 0x46e   :  { %6083 = vmatpush3.bf16.msra.mxu0 %v6082_v51  ;;  %v3913_v51 = vld [vmem:[%s8190_s9 + $0x2c0] sm:$0xff] }
 0x46f   :  { %6038 = vmatpush3.bf16.msra.mxu1 %v6037_v49  ;;  %v3875_v49 = vld [vmem:[%s8190_s9 + $0x1c0] sm:$0xff]  ;;  %6084 = vmatprep.subr.bf16.mxu0 %v6340_v3 }
 0x470   :  { %6039 = vmatprep.subr.bf16.mxu1 %v6340_v3 }
 0x473   :  { %6041 = vmatpush3.bf16.msra.mxu1 %v6040_v53  ;;  %v3858_v53 = vld [vmem:[%s8190_s9 + $0x150] sm:$0xff] }
 0x474   :  { %6042 = vmatprep.subr.bf16.mxu1 %v6340_v3 }
 0x523   :  { %v2206_v55 = vpop.f32.mrb[64].mxu1 }
 0x524   :  { %v5239_v57 = vpop.f32.mrb[65].mxu1 }
 0x525   :  { %v6109_v57 = vpack.c.bf16 %v3876_v50, %v3875_v49  ;;  %v3896_v49 = vld [vmem:[%s8190_s9 + $0x250] sm:$0xff]  ;;  %v3897_v50 = vld [vmem:[%s8190_s9 + $0x258] sm:$0xff] }
 0x529   :  { %v2297_v52 = vpop.f32.mrb[66].mxu1 }
 0x52a   :  { %5282 = vmatmul.mubr.f32.vlgmr.msra.gmra.mrb[68].mxu1 %v2297_v52  ;;  %v5248_v4 = vpop.f32.mrb[67].mxu1  ;;  %v3878_v52 = vld [vmem:[%s8190_s9 + $0x1d8] sm:$0xff] }
 0x52b   :  { %6044 = vmatpush3.bf16.msra.mxu1 %v6043_v62  ;;  %5316 = vmatprep.mubr.msk.f32.mxu1 %vm6341_vm1, %v6342_v6  ;;  %v3861_v62 = vld [vmem:[%s8190_s9 + $0x168] sm:$0xff]  ;;  %v3862_v4 = vld [vmem:[%s8190_s9 + $0x170] sm:$0xff] }
 0x52c   :  { %6045 = vmatprep.subr.bf16.mxu1 %v6340_v3  ;;  %v6088_v63 = vpack.c.bf16 %v3861_v62, %v3860_v61  ;;  %v6091_v2 = vpack.c.bf16 %v3863_v60, %v3862_v4  ;;  %v3899_v61 = vld [vmem:[%s8190_s9 + $0x268] sm:$0xff]  ;;  %v3917_v60 = vld [vmem:[%s8190_s9 + $0x2e0] sm:$0xff] }
 0x52f   :  { %6047 = vmatpush3.bf16.msra.mxu1 %v6046_v5  ;;  %v6112_v5 = vpack.c.bf16 %v3878_v52, %v3877_v1  ;;  %v3916_v1 = vld [vmem:[%s8190_s9 + $0x2d8] sm:$0xff]  ;;  %v3900_v52 = vld [vmem:[%s8190_s9 + $0x270] sm:$0xff] }
 0x530   :  { %6048 = vmatprep.subr.bf16.mxu1 %v6340_v3 }
 0x533   :  { %6050 = vmatpush3.bf16.msra.mxu1 %v6049_v8  ;;  %v3880_v8 = vld [vmem:[%s8190_s9 + $0x1e8] sm:$0xff] }
 0x534   :  { %6051 = vmatprep.subr.bf16.mxu1 %v6340_v3  ;;  %v6115_v9 = vpack.c.bf16 %v3880_v8, %v3879_v7  ;;  %v3918_v7 = vld [vmem:[%s8190_s9 + $0x2e8] sm:$0xff] }
 0x537   :  { %6053 = vmatpush3.bf16.msra.mxu1 %v6052_v10  ;;  %v3881_v10 = vld [vmem:[%s8190_s9 + $0x1f0] sm:$0xff] }
 0x538   :  { %6054 = vmatprep.subr.bf16.mxu1 %v6340_v3  ;;  %v6118_v12 = vpack.c.bf16 %v3882_v11, %v3881_v10  ;;  %v3920_v10 = vld [vmem:[%s8190_s9 + $0x2f8] sm:$0xff] }
 0x53b   :  { %6056 = vmatpush3.bf16.msra.mxu1 %v6055_v13 }
 0x53c   :  { %6057 = vmatprep.subr.bf16.mxu1 %v6340_v3 }
 0x53f   :  { %6059 = vmatpush3.bf16.msra.mxu1 %v6058_v25 }
 0x540   :  { %6060 = vmatprep.subr.bf16.mxu1 %v6340_v3 }
 0x543   :  { %6062 = vmatpush3.bf16.msra.mxu1 %v6061_v40 }
 0x544   :  { %6063 = vmatprep.subr.bf16.mxu1 %v6340_v3 }
 0x547   :  { %6065 = vmatpush3.bf16.msra.mxu1 %v6064_v54  ;;  %v3883_v54 = vld [vmem:[%s8189_s8 + $0x8] sm:$0x3] }
 0x548   :  { %6066 = vmatprep.subr.bf16.mxu1 %v6340_v3 }
 0x54a   :  { %5317 = vmatmul.mubr.f32.vlgmr.msra.gmra.mrb[70].mxu1 %v2206_v55  ;;  %v3859_v55 = vld [vmem:[%s8190_s9 + $0x158] sm:$0xff] }
 0x54b   :  { %6068 = vmatpush3.bf16.msra.mxu1 %v7541_v18  ;;  %5325 = vmatprep.mubr.msk.f32.mxu1 %vm6341_vm1, %v6342_v6  ;;  %v6085_v58 = vpack.c.bf16 %v3859_v55, %v3858_v53  ;;  %v3914_v53 = vld [vmem:[%s8190_s9 + $0x2c8] sm:$0xff]  ;;  %v6139_v55 = vpack.c.bf16 %v3897_v50, %v3896_v49  ;;  %v3934_v49 = vld [vmem:[%s8190_s9 + $0x350] sm:$0xff]  ;;  %v3935_v50 = vld [vmem:[%s8190_s9 + $0x358] sm:$0xff] }
 0x54c   :  { %5323 = vmatprep.subr.mxu1 %v6342_v6 }
 0x54d   :  { %6086 = vmatpush3.bf16.msra.mxu0 %v6085_v58  ;;  %v3898_v58 = vld [vmem:[%s8190_s9 + $0x260] sm:$0xff] }
 0x54e   :  { %6087 = vmatprep.subr.bf16.mxu0 %v6340_v3  ;;  %v6142_v62 = vpack.c.bf16 %v3899_v61, %v3898_v58  ;;  %v3936_v58 = vld [vmem:[%s8190_s9 + $0x360] sm:$0xff]  ;;  %v3937_v61 = vld [vmem:[%s8190_s9 + $0x368] sm:$0xff] }
 0x54f   :  { %5324 = vmatpush3.msk.msra.mxu1 %vm243_vm5, %v7545_v22 }
 0x550   :  { %5326 = vmatmul.mubr.msk.f32.vlgmr.msra.gmra.mrb[72].mxu1 %vm2133_vm7, %v3845_v17  ;;  %6093 = vmatprep.subr.bf16.mxu1 %v6340_v3 }
 0x551   :  { %6095 = vmatpush3.bf16.msra.mxu1 %v7541_v18  ;;  %5369 = vmatprep.mubr.msk.f32.mxu1 %vm6341_vm1, %v6342_v6 }
 0x552   :  { %5367 = vmatprep.subr.mxu1 %v6342_v6  ;;  %6089 = vmatpush3.bf16.msra.mxu0 %v6088_v63  ;;  %v3915_v63 = vld [vmem:[%s8190_s9 + $0x2d0] sm:$0xff] }
 0x553   :  { %6090 = vmatprep.subr.bf16.mxu0 %v6340_v3  ;;  %v6166_v4 = vpack.c.bf16 %v3916_v1, %v3915_v63  ;;  %v3953_v63 = vld [vmem:[%s8190_s9 + $0x3d0] sm:$0xff]  ;;  %v3954_v1 = vld [vmem:[%s8190_s9 + $0x3d8] sm:$0xff] }
 0x555   :  { %5368 = vmatpush3.msk.msra.mxu1 %vm243_vm5, %v7545_v22 }
 0x556   :  { %5370 = vmatmul.mubr.msk.f32.vlgmr.msra.gmra.mrb[74].mxu1 %vm2133_vm7, %v3864_v19  ;;  %6096 = vmatprep.subr.bf16.mxu1 %v6340_v3  ;;  %v6124_v19 = vpack.c.bf16 %v3887_v16, %v3886_v47  ;;  %v3924_v16 = vld [vmem:[%s8190_s9 + $0x300] sm:$0xff] }
 0x557   :  { %5404 = vmatprep.mubr.msk.f32.mxu1 %vm6341_vm1, %v6342_v6  ;;  %6098 = vmatpush3.bf16.msra.mxu1 %v6097_v24  ;;  %v6151_v24 = vpack.c.bf16 %v3906_v20, %v3905_v0  ;;  %v3943_v0 = vld [vmem:[%s8190_s9 + $0x380] sm:$0xff]  ;;  %v3944_v20 = vld [vmem:[%s8190_s9 + $0x388] sm:$0xff] }
 0x558   :  { %6099 = vmatprep.subr.bf16.mxu1 %v6340_v3  ;;  %6092 = vmatpush3.bf16.msra.mxu0 %v6091_v2  ;;  %v6169_v2 = vpack.c.bf16 %v3918_v7, %v3917_v60  ;;  %v3955_v7 = vld [vmem:[%s8190_s9 + $0x3e0] sm:$0xff] }
 0x559   :  { %6120 = vmatprep.subr.bf16.mxu0 %v6340_v3 }
 0x55b   :  { %6101 = vmatpush3.bf16.msra.mxu1 %v6100_v30  ;;  %v6154_v30 = vpack.c.bf16 %v3908_v28, %v3907_v27  ;;  %v3945_v27 = vld [vmem:[%s8190_s9 + $0x390] sm:$0xff]  ;;  %v3946_v28 = vld [vmem:[%s8190_s9 + $0x398] sm:$0xff] }
 0x55c   :  { %6102 = vmatprep.subr.bf16.mxu1 %v6340_v3 }
 0x55f   :  { %6104 = vmatpush3.bf16.msra.mxu1 %v6103_v39  ;;  %v6157_v39 = vpack.c.bf16 %v3910_v36, %v3909_v35  ;;  %v3947_v35 = vld [vmem:[%s8190_s9 + $0x3a0] sm:$0xff]  ;;  %v3948_v36 = vld [vmem:[%s8190_s9 + $0x3a8] sm:$0xff] }
 0x560   :  { %6105 = vmatprep.subr.bf16.mxu1 %v6340_v3 }
 0x563   :  { %6107 = vmatpush3.bf16.msra.mxu1 %v6106_v45  ;;  %v6160_v45 = vpack.c.bf16 %v3912_v44, %v3911_v43  ;;  %v3949_v43 = vld [vmem:[%s8190_s9 + $0x3b0] sm:$0xff]  ;;  %v3950_v44 = vld [vmem:[%s8190_s9 + $0x3b8] sm:$0xff] }
 0x564   :  { %6108 = vmatprep.subr.bf16.mxu1 %v6340_v3 }
 0x567   :  { %6110 = vmatpush3.bf16.msra.mxu1 %v6109_v57  ;;  %v6163_v57 = vpack.c.bf16 %v3914_v53, %v3913_v51  ;;  %v3951_v51 = vld [vmem:[%s8190_s9 + $0x3c0] sm:$0xff]  ;;  %v3952_v53 = vld [vmem:[%s8190_s9 + $0x3c8] sm:$0xff] }
 0x568   :  { %6111 = vmatprep.subr.bf16.mxu1 %v6340_v3 }
 0x56b   :  { %6113 = vmatpush3.bf16.msra.mxu1 %v6112_v5  ;;  %v3901_v5 = vld [vmem:[%s8190_s9 + $0x278] sm:$0xff] }
 0x56c   :  { %6114 = vmatprep.subr.bf16.mxu1 %v6340_v3  ;;  %v6145_v8 = vpack.c.bf16 %v3901_v5, %v3900_v52  ;;  %v3938_v52 = vld [vmem:[%s8190_s9 + $0x370] sm:$0xff]  ;;  %v3939_v5 = vld [vmem:[%s8190_s9 + $0x378] sm:$0xff] }
 0x56d   :  { %v6199_v60 = vpack.c.bf16 %v3939_v5, %v3938_v52 }
 0x56f   :  { %6116 = vmatpush3.bf16.msra.mxu1 %v6115_v9  ;;  %v3919_v9 = vld [vmem:[%s8190_s9 + $0x2f0] sm:$0xff] }
 0x570   :  { %6117 = vmatprep.subr.bf16.mxu1 %v6340_v3  ;;  %v6172_v11 = vpack.c.bf16 %v3920_v10, %v3919_v9  ;;  %v3957_v9 = vld [vmem:[%s8190_s9 + $0x3f0] sm:$0xff]  ;;  %v3958_v10 = vld [vmem:[%s8190_s9 + $0x3f8] sm:$0xff] }
 0x573   :  { %6119 = vmatpush3.bf16.msra.mxu1 %v6118_v12 }
 0x574   :  { %6147 = vmatprep.subr.bf16.mxu1 %v6340_v3 }
 0x5fd   :  { %v2384_v13 = vpop.f32.mrb[68].mxu1 }
 0x5fe   :  { %v5283_v48 = vpop.f32.mrb[69].mxu1 }
 0x61d   :  { %v2454_v21 = vpop.f32.mrb[70].mxu1 }
 0x61e   :  { %v7817_v25 = vadd.f32 %v2454_v21, %v2384_v13  ;;  %v5318_v33 = vpop.f32.mrb[71].mxu1 }
 0x623   :  { %v2529_v14 = vpop.f32.mrb[72].mxu1 }
 0x624   :  { %5361 = vmatmul.mubr.f32.vlgmr.msra.gmra.mrb[22].mxu0 %v2529_v14  ;;  %v5327_v40 = vpop.f32.mrb[73].mxu1 }
 0x625   :  { %6122 = vmatpush3.bf16.msra.mxu0 %v7541_v18  ;;  %5413 = vmatprep.mubr.msk.f32.mxu0 %vm6341_vm1, %v6342_v6 }
 0x626   :  { %5411 = vmatprep.subr.mxu0 %v6342_v6 }
 0x629   :  { %5412 = vmatpush3.msk.msra.mxu0 %vm243_vm5, %v7545_v22  ;;  %v2692_v17 = vpop.f32.mrb[74].mxu1 }
 0x62a   :  { %5414 = vmatmul.mubr.msk.f32.vlgmr.msra.gmra.mrb[24].mxu0 %vm2133_vm7, %v3883_v54  ;;  %5405 = vmatmul.mubr.f32.vlgmr.msra.gmra.mrb[76].mxu1 %v2692_v17  ;;  %v5371_v34 = vpop.f32.mrb[75].mxu1  ;;  %v3921_v54 = vld [vmem:[%s8189_s8 + $0xc] sm:$0x3] }
 0x62b   :  { %6149 = vmatpush3.bf16.msra.mxu1 %v7541_v18  ;;  %5457 = vmatprep.mubr.msk.f32.mxu1 %vm6341_vm1, %v6342_v6 }
 0x62c   :  { %5455 = vmatprep.subr.mxu1 %v6342_v6  ;;  %6123 = vmatprep.subr.bf16.mxu0 %v6340_v3 }
 0x62d   :  { %6125 = vmatpush3.bf16.msra.mxu0 %v6124_v19  ;;  %5448 = vmatprep.mubr.msk.f32.mxu0 %vm6341_vm1, %v6342_v6 }
 0x62e   :  { %6126 = vmatprep.subr.bf16.mxu0 %v6340_v3 }
 0x62f   :  { %5456 = vmatpush3.msk.msra.mxu1 %vm243_vm5, %v7545_v22 }
 0x630   :  { %5458 = vmatmul.mubr.msk.f32.vlgmr.msra.gmra.mrb[78].mxu1 %vm2133_vm7, %v3902_v56  ;;  %6150 = vmatprep.subr.bf16.mxu1 %v6340_v3  ;;  %v3940_v56 = vld [vmem:[%s8189_s8 + $0xe] sm:$0x3] }
 0x631   :  { %6128 = vmatpush3.bf16.msra.mxu0 %v6127_v23  ;;  %6152 = vmatpush3.bf16.msra.mxu1 %v6151_v24  ;;  %v6181_v23 = vpack.c.bf16 %v3927_v15, %v3926_v59  ;;  %v6205_v24 = vpack.c.bf16 %v3944_v20, %v3943_v0  ;;  %v3965_v59 = vld [vmem:[%s8190_s9 + $0x418] sm:$0xff]  ;;  %v3966_v0 = vld [vmem:[%s8190_s9 + $0x420] sm:$0xff]  ;;  %v3967_v20 = vld [vmem:[%s8190_s9 + $0x428] sm:$0xff] }
 0x632   :  { %6129 = vmatprep.subr.bf16.mxu0 %v6340_v3  ;;  %6153 = vmatprep.subr.bf16.mxu1 %v6340_v3 }
 0x633   :  { %5492 = vmatprep.mubr.msk.f32.mxu1 %vm6341_vm1, %v6342_v6 }
 0x635   :  { %6131 = vmatpush3.bf16.msra.mxu0 %v6130_v29  ;;  %6155 = vmatpush3.bf16.msra.mxu1 %v6154_v30  ;;  %v6184_v29 = vpack.c.bf16 %v3929_v26, %v3928_v41  ;;  %v6208_v30 = vpack.c.bf16 %v3946_v28, %v3945_v27  ;;  %v3971_v41 = vld [vmem:[%s8190_s9 + $0x448] sm:$0xff]  ;;  %v3972_v27 = vld [vmem:[%s8190_s9 + $0x450] sm:$0xff]  ;;  %v3973_v28 = vld [vmem:[%s8190_s9 + $0x458] sm:$0xff] }
 0x636   :  { %6132 = vmatprep.subr.bf16.mxu0 %v6340_v3  ;;  %6156 = vmatprep.subr.bf16.mxu1 %v6340_v3 }
 0x639   :  { %6134 = vmatpush3.bf16.msra.mxu0 %v6133_v37  ;;  %6158 = vmatpush3.bf16.msra.mxu1 %v6157_v39  ;;  %v6187_v37 = vpack.c.bf16 %v3931_v32, %v3930_v31  ;;  %v6211_v39 = vpack.c.bf16 %v3948_v36, %v3947_v35  ;;  %v3975_v31 = vld [vmem:[%s8190_s9 + $0x468] sm:$0xff]  ;;  %v3976_v35 = vld [vmem:[%s8190_s9 + $0x470] sm:$0xff]  ;;  %v3977_v36 = vld [vmem:[%s8190_s9 + $0x478] sm:$0xff] }
 0x63a   :  { %6135 = vmatprep.subr.bf16.mxu0 %v6340_v3  ;;  %6159 = vmatprep.subr.bf16.mxu1 %v6340_v3 }
 0x63d   :  { %6137 = vmatpush3.bf16.msra.mxu0 %v6136_v46  ;;  %6161 = vmatpush3.bf16.msra.mxu1 %v6160_v45  ;;  %v6190_v46 = vpack.c.bf16 %v3933_v38, %v3932_v42  ;;  %v6214_v45 = vpack.c.bf16 %v3950_v44, %v3949_v43 }
 0x63e   :  { %6138 = vmatprep.subr.bf16.mxu0 %v6340_v3  ;;  %6162 = vmatprep.subr.bf16.mxu1 %v6340_v3 }
 0x641   :  { %6140 = vmatpush3.bf16.msra.mxu0 %v6139_v55  ;;  %6164 = vmatpush3.bf16.msra.mxu1 %v6163_v57  ;;  %v6193_v55 = vpack.c.bf16 %v3935_v50, %v3934_v49  ;;  %v6217_v57 = vpack.c.bf16 %v3952_v53, %v3951_v51  ;;  %v3978_v50 = vld [vmem:[%s8191_s10] ss:$0 sm:$0xff] }
 0x642   :  { %6141 = vmatprep.subr.bf16.mxu0 %v6340_v3  ;;  %6165 = vmatprep.subr.bf16.mxu1 %v6340_v3 }
 0x645   :  { %6143 = vmatpush3.bf16.msra.mxu0 %v6142_v62  ;;  %6167 = vmatpush3.bf16.msra.mxu1 %v6166_v4  ;;  %v6196_v62 = vpack.c.bf16 %v3937_v61, %v3936_v58  ;;  %v6220_v4 = vpack.c.bf16 %v3954_v1, %v3953_v63 }
 0x646   :  { %6144 = vmatprep.subr.bf16.mxu0 %v6340_v3  ;;  %6168 = vmatprep.subr.bf16.mxu1 %v6340_v3 }
 0x649   :  { %6146 = vmatpush3.bf16.msra.mxu0 %v6145_v8  ;;  %6170 = vmatpush3.bf16.msra.mxu1 %v6169_v2  ;;  %v3956_v8 = vld [vmem:[%s8190_s9 + $0x3e8] sm:$0xff] }
 0x64a   :  { %6174 = vmatprep.subr.bf16.mxu0 %v6340_v3  ;;  %6171 = vmatprep.subr.bf16.mxu1 %v6340_v3  ;;  %v6223_v2 = vpack.c.bf16 %v3956_v8, %v3955_v7 }
 0x64d   :  { %6173 = vmatpush3.bf16.msra.mxu1 %v6172_v11  ;;  %v6226_v11 = vpack.c.bf16 %v3958_v10, %v3957_v9 }
 0x64e   :  { %6201 = vmatprep.subr.bf16.mxu1 %v6340_v3 }
 0x6f7   :  { %v2616_v12 = vpop.f32.mrb[22].mxu0 }
 0x6f8   :  { %v2620_v13 = vadd.f32 %v2616_v12, %v7817_v25  ;;  %v5362_v48 = vpop.f32.mrb[23].mxu0  ;;  %v3925_v25 = vld [vmem:[%s8190_s9 + $0x308] sm:$0xff] }
 0x6f9   :  { %v6178_v19 = vpack.c.bf16 %v3925_v25, %v3924_v16  ;;  %v3962_v25 = vld [vmem:[%s8190_s9 + $0x400] sm:$0xff] }
 0x6fd   :  { %v2855_v21 = vpop.f32.mrb[24].mxu0  ;;  %v2779_v33 = vpop.f32.mrb[76].mxu1 }
 0x6fe   :  { %v7958_v14 = vadd.f32 %v2779_v33, %v2620_v13  ;;  %5449 = vmatmul.mubr.f32.vlgmr.msra.gmra.mrb[26].mxu0 %v2855_v21  ;;  %v5406_v40 = vpop.f32.mrb[77].mxu1  ;;  %v5415_v47 = vpop.f32.mrb[25].mxu0 }
 0x6ff   :  { %6176 = vmatpush3.bf16.msra.mxu0 %v7541_v18  ;;  %5501 = vmatprep.mubr.msk.f32.mxu0 %vm6341_vm1, %v6342_v6 }
 0x700   :  { %5499 = vmatprep.subr.mxu0 %v6342_v6 }
 0x703   :  { %5500 = vmatpush3.msk.msra.mxu0 %vm243_vm5, %v7545_v22  ;;  %v3018_v17 = vpop.f32.mrb[78].mxu1 }
 0x704   :  { %5502 = vmatmul.mubr.msk.f32.vlgmr.msra.gmra.mrb[28].mxu0 %vm2133_vm7, %v3921_v54  ;;  %5493 = vmatmul.mubr.f32.vlgmr.msra.gmra.mrb[80].mxu1 %v3018_v17  ;;  %v5459_v34 = vpop.f32.mrb[79].mxu1  ;;  %v3959_v54 = vld [vmem:[%s8189_s8 + $0x10] sm:$0x3] }
 0x705   :  { %6203 = vmatpush3.bf16.msra.mxu1 %v7541_v18  ;;  %5545 = vmatprep.mubr.msk.f32.mxu1 %vm6341_vm1, %v6342_v6  ;;  %v6238_v34 = vpack.c.bf16 %v3967_v20, %v3966_v0 }
 0x706   :  { %5543 = vmatprep.subr.mxu1 %v6342_v6  ;;  %6177 = vmatprep.subr.bf16.mxu0 %v6340_v3 }
 0x707   :  { %6179 = vmatpush3.bf16.msra.mxu0 %v6178_v19  ;;  %5536 = vmatprep.mubr.msk.f32.mxu0 %vm6341_vm1, %v6342_v6  ;;  %v3964_v19 = vld [vmem:[%s8190_s9 + $0x410] sm:$0xff] }
 0x708   :  { %6180 = vmatprep.subr.bf16.mxu0 %v6340_v3 }
 0x709   :  { %5544 = vmatpush3.msk.msra.mxu1 %vm243_vm5, %v7545_v22 }
 0x70a   :  { %5546 = vmatmul.mubr.msk.f32.vlgmr.msra.gmra.mrb[82].mxu1 %vm2133_vm7, %v3940_v56  ;;  %6204 = vmatprep.subr.bf16.mxu1 %v6340_v3  ;;  %v3969_v56 = vld [vmem:[%s8190_s9 + $0x438] sm:$0xff] }
 0x70b   :  { %6182 = vmatpush3.bf16.msra.mxu0 %v6181_v23  ;;  %6206 = vmatpush3.bf16.msra.mxu1 %v6205_v24  ;;  %v3970_v24 = vld [vmem:[%s8190_s9 + $0x440] sm:$0xff] }
 0x70c   :  { %6183 = vmatprep.subr.bf16.mxu0 %v6340_v3  ;;  %6207 = vmatprep.subr.bf16.mxu1 %v6340_v3  ;;  %v6244_v26 = vpack.c.bf16 %v3971_v41, %v3970_v24 }
 0x70d   :  { %5580 = vmatprep.mubr.msk.f32.mxu1 %vm6341_vm1, %v6342_v6 }
 0x70f   :  { %6185 = vmatpush3.bf16.msra.mxu0 %v6184_v29  ;;  %6209 = vmatpush3.bf16.msra.mxu1 %v6208_v30  ;;  %v6247_v29 = vpack.c.bf16 %v3973_v28, %v3972_v27  ;;  %v3974_v30 = vld [vmem:[%s8190_s9 + $0x460] sm:$0xff] }
 0x710   :  { %6186 = vmatprep.subr.bf16.mxu0 %v6340_v3  ;;  %6210 = vmatprep.subr.bf16.mxu1 %v6340_v3  ;;  %v6250_v32 = vpack.c.bf16 %v3975_v31, %v3974_v30 }
 0x713   :  { %6188 = vmatpush3.bf16.msra.mxu0 %v6187_v37  ;;  %6212 = vmatpush3.bf16.msra.mxu1 %v6211_v39  ;;  %v6253_v37 = vpack.c.bf16 %v3977_v36, %v3976_v35 }
 0x714   :  { %6189 = vmatprep.subr.bf16.mxu0 %v6340_v3  ;;  %6213 = vmatprep.subr.bf16.mxu1 %v6340_v3 }
 0x717   :  { %6191 = vmatpush3.bf16.msra.mxu0 %v6190_v46  ;;  %6215 = vmatpush3.bf16.msra.mxu1 %v6214_v45 }
 0x718   :  { %6192 = vmatprep.subr.bf16.mxu0 %v6340_v3  ;;  %6216 = vmatprep.subr.bf16.mxu1 %v6340_v3 }
 0x71b   :  { %6194 = vmatpush3.bf16.msra.mxu0 %v6193_v55  ;;  %6218 = vmatpush3.bf16.msra.mxu1 %v6217_v57 }
 0x71c   :  { %6195 = vmatprep.subr.bf16.mxu0 %v6340_v3  ;;  %6219 = vmatprep.subr.bf16.mxu1 %v6340_v3 }
 0x71f   :  { %6197 = vmatpush3.bf16.msra.mxu0 %v6196_v62  ;;  %6221 = vmatpush3.bf16.msra.mxu1 %v6220_v4 }
 0x720   :  { %6198 = vmatprep.subr.bf16.mxu0 %v6340_v3  ;;  %6222 = vmatprep.subr.bf16.mxu1 %v6340_v3 }
 0x723   :  { %6200 = vmatpush3.bf16.msra.mxu0 %v6199_v60  ;;  %6224 = vmatpush3.bf16.msra.mxu1 %v6223_v2 }
 0x724   :  { %6228 = vmatprep.subr.bf16.mxu0 %v6340_v3  ;;  %6225 = vmatprep.subr.bf16.mxu1 %v6340_v3 }
 0x727   :  { %6227 = vmatpush3.bf16.msra.mxu1 %v6226_v11 }
 0x7d1   :  { %v2942_v12 = vpop.f32.mrb[26].mxu0 }
 0x7d2   :  { %v2946_v13 = vadd.f32 %v2942_v12, %v7958_v14  ;;  %v5450_v48 = vpop.f32.mrb[27].mxu0  ;;  %v3963_v14 = vld [vmem:[%s8190_s9 + $0x408] sm:$0xff] }
 0x7d3   :  { %v6232_v17 = vpack.c.bf16 %v3963_v14, %v3962_v25 }
 0x7d7   :  { %v3181_v21 = vpop.f32.mrb[28].mxu0  ;;  %v3105_v33 = vpop.f32.mrb[80].mxu1 }
 0x7d8   :  { %v3109_v40 = vadd.f32 %v3105_v33, %v2946_v13  ;;  %5537 = vmatmul.mubr.f32.vlgmr.msra.gmra.mrb[30].mxu0 %v3181_v21  ;;  %v5494_v47 = vpop.f32.mrb[81].mxu1  ;;  %v5503_v16 = vpop.f32.mrb[29].mxu0 }
 0x7d9   :  { %6230 = vmatpush3.bf16.msra.mxu0 %v7541_v18  ;;  %5589 = vmatprep.mubr.msk.f32.mxu0 %vm6341_vm1, %v6342_v6 }
 0x7da   :  { %5587 = vmatprep.subr.mxu0 %v6342_v6 }
 0x7dd   :  { %5588 = vmatpush3.msk.msra.mxu0 %vm243_vm5, %v7545_v22  ;;  %v3344_v18 = vpop.f32.mrb[82].mxu1  ;;  %v6235_v22 = vpack.c.bf16 %v3965_v59, %v3964_v19 }
 0x7de   :  { %5590 = vmatmul.mubr.msk.f32.vlgmr.msra.gmra.mrb[32].mxu0 %vm2133_vm7, %v3959_v54  ;;  %5581 = vmatmul.mubr.f32.vlgmr.msra.gmra.mrb[84].mxu1 %v3344_v18  ;;  %v5547_v15 = vpop.f32.mrb[83].mxu1 }
 0x7df   :  { %6231 = vmatprep.subr.bf16.mxu0 %v6340_v3  ;;  %5624 = vmatprep.mubr.msk.f32.mxu0 %vm6341_vm1, %v6342_v6  ;;  %v3968_v6 = vld [vmem:[%s8190_s9 + $0x430] sm:$0xff]  ;;  %s6316_s9 = scalar_lea.vmem %s3615_s4, 32 }
 0x7e0   :  { %6233 = vmatpush3.bf16.msra.mxu0 %v6232_v17  ;;  %v6241_v23 = vpack.c.bf16 %v3969_v56, %v3968_v6  ;;  %p6317_p0 = scmp.ne.s32.totalorder %s3615_s4, %s6316_s9  ;;  %p6322_p2 = scmp.lt.s32.totalorder %s6316_s9, %s6316_s9 }
 0x7e1   :  { %6234 = vmatprep.subr.bf16.mxu0 %v6340_v3 }
 0x7e2   :  { %p6323_p3 = por %p6322_p2, %p6321_p1 }
 0x7e4   :  { %6236 = vmatpush3.bf16.msra.mxu0 %v6235_v22  ;;  %p6324_p4 = pnand %p6323_p3, %p6317_p0 }
 0x7e5   :  { %6237 = vmatprep.subr.bf16.mxu0 %v6340_v3 }
 0x7e8   :  { %6239 = vmatpush3.bf16.msra.mxu0 %v6238_v34 }
 0x7e9   :  { %6240 = vmatprep.subr.bf16.mxu0 %v6340_v3 }
 0x7ec   :  { %6242 = vmatpush3.bf16.msra.mxu0 %v6241_v23 }
 0x7ed   :  { %6243 = vmatprep.subr.bf16.mxu0 %v6340_v3 }
 0x7f0   :  { %6245 = vmatpush3.bf16.msra.mxu0 %v6244_v26 }
 0x7f1   :  { %6246 = vmatprep.subr.bf16.mxu0 %v6340_v3 }
 0x7f4   :  { %6248 = vmatpush3.bf16.msra.mxu0 %v6247_v29 }
 0x7f5   :  { %6249 = vmatprep.subr.bf16.mxu0 %v6340_v3 }
 0x7f8   :  { %6251 = vmatpush3.bf16.msra.mxu0 %v6250_v32 }
 0x7f9   :  { %6252 = vmatprep.subr.bf16.mxu0 %v6340_v3 }
 0x7fc   :  { %6254 = vmatpush3.bf16.msra.mxu0 %v6253_v37 }
 0x8ab   :  { %v3268_v39 = vpop.f32.mrb[30].mxu0 }
 0x8ac   :  { %v3272_v42 = vadd.f32 %v3268_v39, %v3109_v40  ;;  %v5538_v38 = vpop.f32.mrb[31].mxu0 }
 0x8b1   :  { %v3507_v43 = vpop.f32.mrb[32].mxu0  ;;  %v3431_v44 = vpop.f32.mrb[84].mxu1 }
 0x8b2   :  { %v3435_v46 = vadd.f32 %v3431_v44, %v3272_v42  ;;  %5625 = vmatmul.mubr.f32.vlgmr.msra.gmra.mrb[34].mxu0 %v3507_v43  ;;  %v5591_v45 = vpop.f32.mrb[33].mxu0  ;;  %v5582_v49 = vpop.f32.mrb[85].mxu1 }
 0x985   :  { %v3594_v3 = vpop.f32.mrb[34].mxu0 }
 0x986   :  { %v3598_v51 = vadd.f32 %v3594_v3, %v3435_v46  ;;  %v5626_v53 = vpop.f32.mrb[35].mxu0 }
 0x988   :  { %v3606_v55 = vadd.f32 %v3978_v50, %v3598_v51 }
 0x98a   :  { %3607 = vst [vmem:[#allocation2] sm:$0x3] %v3606_v55 }
 0x98b   :  { %6327 = shalt.err (!%p6324_p4)
}
 0x98c   :  { %s6328_s13 = scalar_lea.hbm %s8192_s11, 32 }
 0x98d   :  { %p6329_p5 = scmp.ne.s32.totalorder %s8192_s11, %s6328_s13  ;;  %p6332_p6 = scmp.lt.u32.totalorder %s6328_s13, %s8192_s11 }
 0x98f   :  { %p6334_p7 = pnand %p6332_p6, %p6329_p5 }
 0x991   :  { %6337 = shalt.err (!%p6334_p7)
}
 0x992   :  { %3617 = dma.vmem_to_hbm [thread:$0]  %s3615_s4, 32, %s8192_s11, [#allocation3]  }
 0x993   :  { %6338 = dma.done.wait [#allocation3], 32  }
 0x994   :  { %6339 = vsyncadd [#allocation3], 4294967264 }
 0x995   :  { %3621 = vsyncpa [#allocation3], 1 }

</bundles_post_ra>
